<compile_context>
chip_gen: v6e
topology: v6e:2x2x1
jax: 0.10.0
libtpu: 0.0.40
codegen_flags: <defaults>
</compile_context>

<pallas_src>
import functools

import jax
import jax.numpy as jnp
from jax import lax
from jax.experimental import pallas as pl
from jax.experimental.pallas import tpu as pltpu


# ----------------------------------------------------------------------------
# helpers
# ----------------------------------------------------------------------------
def _pick_row_tile(m):
    """Largest row tile <= 512 that evenly divides m (keeps (8,128) rules happy)."""
    for t in (512, 256, 128, 64, 32, 16, 8):
        if m >= t and m % t == 0:
            return t
    return m


_PARALLEL_1D = pltpu.CompilerParams(dimension_semantics=("parallel",))


# ----------------------------------------------------------------------------
# Kernel 1: RMSNorm fused into the following projection matmul
# ----------------------------------------------------------------------------
def _rmsnorm_matmul_kernel(x_ref, g_ref, w_ref, b_ref, o_ref, *, eps):
    x = x_ref[...].astype(jnp.float32)                        # (tm, K)
    inv = lax.rsqrt(jnp.mean(x * x, axis=-1, keepdims=True) + eps)
    xn = g_ref[...] * x * inv
    acc = jnp.dot(xn, w_ref[...], preferred_element_type=jnp.float32)
    o_ref[...] = (acc + b_ref[...]).astype(o_ref.dtype)


def rmsnorm_matmul(x, gamma, w, b, eps):
    """rmsnorm(x) @ w + b.   x: (M, K), w: (K, N), gamma: (K,), b: (N,)."""
    M, K = x.shape
    N = w.shape[1]
    tm = _pick_row_tile(M)
    return pl.pallas_call(
        functools.partial(_rmsnorm_matmul_kernel, eps=eps),
        out_shape=jax.ShapeDtypeStruct((M, N), x.dtype),
        grid=(M // tm,),
        in_specs=[
            pl.BlockSpec((tm, K), lambda i: (i, 0)),
            pl.BlockSpec((1, K), lambda i: (0, 0)),
            pl.BlockSpec((K, N), lambda i: (0, 0)),
            pl.BlockSpec((1, N), lambda i: (0, 0)),
        ],
        out_specs=pl.BlockSpec((tm, N), lambda i: (i, 0)),
        compiler_params=_PARALLEL_1D,
    )(x, gamma.reshape(1, K), w, b.reshape(1, N))


# ----------------------------------------------------------------------------
# Kernel 2: grouped-query attention + composed out-projection + residual
# ----------------------------------------------------------------------------
def _attn_block_kernel(qkv_ref, bias_ref, wout_ref, bout_ref, res_ref, o_ref, *,
                       n_groups, n_q_heads, head_dim):
    # qkv_ref:  (S, G*(H+2)*Dh)  layout per group: [q_0..q_{H-1}, k, v]; Q pre-scaled
    # bias_ref: (S, S) additive mask, 0 = keep, -1e30 = masked
    # wout_ref: (G*H*Dh, E) composed output projection, bout_ref: (1, E)
    # res_ref / o_ref: (S, E)
    per_g = (n_q_heads + 2) * head_dim
    hdh = n_q_heads * head_dim
    bias = bias_ref[...]
    outs = []
    for g in range(n_groups):
        base = g * per_g
        k = qkv_ref[:, base + hdh: base + hdh + head_dim]           # (S, Dh)
        v = qkv_ref[:, base + hdh + head_dim: base + per_g]         # (S, Dh)
        for h in range(n_q_heads):
            q = qkv_ref[:, base + h * head_dim: base + (h + 1) * head_dim]
            # contract last dims directly (no transposed copy of K)
            s = lax.dot_general(q, k, (((1,), (1,)), ((), ())),
                                preferred_element_type=jnp.float32) + bias
            s = s - jnp.max(s, axis=-1, keepdims=True)
            p = jnp.exp(s)
            l = jnp.sum(p, axis=-1, keepdims=True)
            o = lax.dot_general(p, v, (((1,), (0,)), ((), ())),
                                preferred_element_type=jnp.float32)  # (S, Dh)
            outs.append(o / l)      # exact softmax normalization (matches reference)
    attn = jnp.concatenate(outs, axis=-1)                            # (S, G*H*Dh)
    acc = jnp.dot(attn, wout_ref[...], preferred_element_type=jnp.float32)
    o_ref[...] = (res_ref[...].astype(jnp.float32) + acc
                  + bout_ref[...]).astype(o_ref.dtype)


def attention_block(qkv, mask_bias, w_out, b_out, residual, *, n_groups,
                    n_q_heads, head_dim):
    """attention(qkv) @ w_out + b_out + residual.
    qkv: (B, S, G*(H+2)*Dh), mask_bias: (B, S, S), residual: (B, S, E)."""
    B, S, n_qkv = qkv.shape
    E = w_out.shape[1]
    n_attn = n_groups * n_q_heads * head_dim
    return pl.pallas_call(
        functools.partial(_attn_block_kernel, n_groups=n_groups,
                          n_q_heads=n_q_heads, head_dim=head_dim),
        out_shape=jax.ShapeDtypeStruct((B, S, E), qkv.dtype),
        grid=(B,),
        in_specs=[
            pl.BlockSpec((None, S, n_qkv), lambda b: (b, 0, 0)),
            pl.BlockSpec((None, S, S), lambda b: (b, 0, 0)),
            pl.BlockSpec((n_attn, E), lambda b: (0, 0)),
            pl.BlockSpec((1, E), lambda b: (0, 0)),
            pl.BlockSpec((None, S, E), lambda b: (b, 0, 0)),
        ],
        out_specs=pl.BlockSpec((None, S, E), lambda b: (b, 0, 0)),
        compiler_params=_PARALLEL_1D,
    )(qkv, mask_bias, w_out, b_out.reshape(1, E), residual)


# ----------------------------------------------------------------------------
# Kernel 3: fused FFN block: rmsnorm -> fc1 -> SwiGLU gate -> fc2 -> +residual
# ----------------------------------------------------------------------------
def _ffn_kernel(x_ref, g_ref, w1_ref, b1_ref, w2_ref, b2_ref, o_ref, *,
                eps, beta, inter):
    x = x_ref[...].astype(jnp.float32)                        # (tm, E) residual input
    inv = lax.rsqrt(jnp.mean(x * x, axis=-1, keepdims=True) + eps)
    xn = g_ref[...] * x * inv
    h = jnp.dot(xn, w1_ref[...], preferred_element_type=jnp.float32) + b1_ref[...]
    x1 = h[:, :inter]
    x2 = h[:, inter:]
    gate = x2 * (1.0 / (1.0 + jnp.exp(-x2 * beta)))           # x2 * sigmoid(beta*x2)
    gated = x1 * gate
    y = jnp.dot(gated, w2_ref[...], preferred_element_type=jnp.float32) + b2_ref[...]
    o_ref[...] = (x + y).astype(o_ref.dtype)


def ffn_fused(x, gamma, w1, b1, w2, b2, eps, beta, inter):
    """x + fc2(swiglu(fc1(rmsnorm(x)))).   x: (M, E)."""
    M, E = x.shape
    H2 = w1.shape[1]            # 2 * intermediate_dim
    I = w2.shape[0]
    tm = _pick_row_tile(M)
    return pl.pallas_call(
        functools.partial(_ffn_kernel, eps=eps, beta=beta, inter=inter),
        out_shape=jax.ShapeDtypeStruct((M, E), x.dtype),
        grid=(M // tm,),
        in_specs=[
            pl.BlockSpec((tm, E), lambda i: (i, 0)),
            pl.BlockSpec((1, E), lambda i: (0, 0)),
            pl.BlockSpec((E, H2), lambda i: (0, 0)),
            pl.BlockSpec((1, H2), lambda i: (0, 0)),
            pl.BlockSpec((I, E), lambda i: (0, 0)),
            pl.BlockSpec((1, E), lambda i: (0, 0)),
        ],
        out_specs=pl.BlockSpec((tm, E), lambda i: (i, 0)),
        compiler_params=_PARALLEL_1D,
    )(x, gamma.reshape(1, E), w1, b1.reshape(1, H2), w2, b2.reshape(1, E))


# ----------------------------------------------------------------------------
# Parameter fusion (exact linear-algebra rewrites, done once per forward)
# ----------------------------------------------------------------------------
def prepare_fused_params(params, cfg):
    E = cfg["embedding_size"]
    H = cfg["n_q_heads"]
    Dh = E // H
    G = cfg["n_kv_heads"]
    scale = 1.0 / (Dh ** 0.5)

    # Fused QKV projection: per group [q_0 .. q_{H-1}, k, v], each E -> Dh.
    # The 1/sqrt(Dh) attention scale is folded into the Q weights/biases (exact).
    w_parts, b_parts = [], []
    for g in range(G):
        p = params["groups"][g]
        for h in range(H):
            w_parts.append(p["q_w"][h] * scale)
            b_parts.append(p["q_b"][h] * scale)
        w_parts += [p["k_w"], p["v_w"]]
        b_parts += [p["k_b"], p["v_b"]]
    w_qkv = jnp.concatenate(w_parts, axis=1)        # (E, G*(H+2)*Dh)
    b_qkv = jnp.concatenate(b_parts, axis=0)        # (G*(H+2)*Dh,)

    # Compose per-group o_proj with the GQA o_proj into one (G*E, E) matmul:
    #   out = sum_g (attn_g @ o_w_g + o_b_g) @ gqa_w[gE:(g+1)E] + gqa_b
    gqa_w = params["gqa_o_w"]                       # (G*E, E)
    w_out_parts = []
    b_out = params["gqa_o_b"]
    for g in range(G):
        p = params["groups"][g]
        gw = gqa_w[g * E:(g + 1) * E]               # (E, E)
        w_out_parts.append(p["o_w"] @ gw)
        b_out = b_out + p["o_b"] @ gw
    w_out = jnp.concatenate(w_out_parts, axis=0)    # (G*E, E)
    return dict(w_qkv=w_qkv, b_qkv=b_qkv, w_out=w_out, b_out=b_out)


# ----------------------------------------------------------------------------
# Decoder forward
# ----------------------------------------------------------------------------
def decoder_forward(x, mask, params, cfg):
    B, S, E = x.shape
    H = cfg["n_q_heads"]
    Dh = E // H
    G = cfg["n_kv_heads"]
    I = cfg["intermediate_dim"]
    eps = cfg["rms_norm_eps"]

    fused = prepare_fused_params(params, cfg)
    x2d = x.reshape(B * S, E)
    # additive mask bias computed once by XLA: 0 = attend, -1e30 = masked
    mask_bias = (mask.astype(jnp.float32) - 1.0) * jnp.float32(1e30)

    # 1) rmsnorm + fused QKV projection (all groups, all heads, one matmul)
    qkv = rmsnorm_matmul(x2d, params["rms_w"], fused["w_qkv"], fused["b_qkv"], eps)
    qkv = qkv.reshape(B, S, -1)

    # RoPE in the reference is a zero-angle rotation (identity) -> intentionally omitted.

    # 2) attention + composed output projection + residual, per batch element
    x2 = attention_block(qkv, mask_bias, fused["w_out"], fused["b_out"], x,
                         n_groups=G, n_q_heads=H, head_dim=Dh)     # (B, S, E)

    # 3) fused FFN block (rmsnorm + fc1 + SwiGLU + fc2 + residual)
    out = ffn_fused(x2.reshape(B * S, E), params["rms_w"],
                    params["fc1_w"], params["fc1_b"],
                    params["fc2_w"], params["fc2_b"],
                    eps, cfg["swiglu_beta"], I)
    return out.reshape(B, S, E)


# ----------------------------------------------------------------------------
# Deterministic parameter init (same structure as the PyTorch module)
# ----------------------------------------------------------------------------
def init_params(key, cfg):
    E = cfg["embedding_size"]
    H = cfg["n_q_heads"]
    Dh = E // H
    G = cfg["n_kv_heads"]
    I = cfg["intermediate_dim"]

    def nrm(k, shape, scale=0.02):
        return scale * jax.random.normal(k, shape, dtype=jnp.float32)

    keys = iter(jax.random.split(key, 64))
    params = {
        "rms_w": jnp.ones((E,), jnp.float32),
        # RoPE frequencies (unused at runtime: rotation angle is identically zero)
        "theta": 1.0 / cfg["rope_theta"] ** (
            jnp.arange(0, Dh, 2, dtype=jnp.float32) / Dh),
        "gqa_o_w": nrm(next(keys), (E * G, E)),
        "gqa_o_b": nrm(next(keys), (E,), 0.01),
        "fc1_w": nrm(next(keys), (E, 2 * I)),
        "fc1_b": nrm(next(keys), (2 * I,), 0.01),
        "fc2_w": nrm(next(keys), (I, E)),
        "fc2_b": nrm(next(keys), (E,), 0.01),
        "groups": [],
    }
    for _ in range(G):
        grp = {
            "q_w": nrm(next(keys), (H, E, Dh)),
            "q_b": nrm(next(keys), (H, Dh), 0.01),
            "k_w": nrm(next(keys), (E, Dh)),
            "k_b": nrm(next(keys), (Dh,), 0.01),
            "v_w": nrm(next(keys), (E, Dh)),
            "v_b": nrm(next(keys), (Dh,), 0.01),
            "o_w": nrm(next(keys), (E, E)),
            "o_b": nrm(next(keys), (E,), 0.01),
        }
        params["groups"].append(grp)
    return params


# ----------------------------------------------------------------------------
if __name__ == "__main__":
    cfg = dict(
        embedding_size=32,
        n_q_heads=4,
        n_kv_heads=2,
        intermediate_dim=64,
        swiglu_beta=1.0,
        rope_theta=10000.0,
        rms_norm_eps=1e-6,
        bias=True,
    )
    B, S, E = 2, 8, cfg["embedding_size"]

    key = jax.random.PRNGKey(0)
    k_x, k_p = jax.random.split(key)
    x = jax.random.normal(k_x, (B, S, E), dtype=jnp.float32)
    # causal mask: 1 = attend, 0 = masked
    mask = jnp.broadcast_to(jnp.tril(jnp.ones((S, S), jnp.float32)), (B, S, S))
    params = init_params(k_p, cfg)

    fwd = jax.jit(lambda x_, m_, p_: decoder_forward(x_, m_, p_, cfg))
    out = fwd(x, mask, params)
    out = jax.block_until_ready(out)
    assert out.shape == (B, S, E) and out.dtype == jnp.float32
    assert bool(jnp.all(jnp.isfinite(out)))
    print("KERNEL_OK")
</pallas_src>

<mosaic_0001>
module attributes {stable_mosaic.version = 11 : i64} {
  func.func @_rmsnorm_matmul_kernel(%arg0: i32, %arg1: memref<16x32xf32, #tpu.memory_space<vmem>>, %arg2: memref<1x32xf32, #tpu.memory_space<vmem>>, %arg3: memref<32x96xf32, #tpu.memory_space<vmem>>, %arg4: memref<1x96xf32, #tpu.memory_space<vmem>>, %arg5: memref<16x96xf32, #tpu.memory_space<vmem>>) attributes {dimension_semantics = [#tpu.dimension_semantics<parallel>], iteration_bounds = array<i64: 1>, scalar_prefetch = 0 : i64, scratch_operands = 0 : i64, tpu.core_type = #tpu.core_type<tc>, window_params = [{transform_indices = @transform_0, window_bounds = array<i64: 16, 32>}, {pipeline_mode = #tpu.pipeline_mode<synchronous>, transform_indices = @transform_1, window_bounds = array<i64: 1, 32>}, {pipeline_mode = #tpu.pipeline_mode<synchronous>, transform_indices = @transform_2, window_bounds = array<i64: 32, 96>}, {pipeline_mode = #tpu.pipeline_mode<synchronous>, transform_indices = @transform_3, window_bounds = array<i64: 1, 96>}, {transform_indices = @transform_4, window_bounds = array<i64: 16, 96>}]} {
    %c0 = arith.constant 0 : index
    %c0_0 = arith.constant 0 : index
    %0 = vector.load %arg1[%c0, %c0_0] : memref<16x32xf32, #tpu.memory_space<vmem>>, vector<16x32xf32>
    %1 = arith.mulf %0, %0 : vector<16x32xf32>
    %cst = arith.constant dense<0.000000e+00> : vector<16xf32>
    %2 = vector.multi_reduction <add>, %1, %cst [1] : vector<16x32xf32> to vector<16xf32>
    %3 = vector.shape_cast %2 : vector<16xf32> to vector<16x1xf32>
    %cst_1 = arith.constant 3.200000e+01 : f32
    %4 = vector.broadcast %cst_1 : f32 to vector<16x1xf32>
    %5 = arith.divf %3, %4 : vector<16x1xf32>
    %cst_2 = arith.constant 9.99999997E-7 : f32
    %6 = vector.broadcast %cst_2 : f32 to vector<16x1xf32>
    %7 = arith.addf %5, %6 : vector<16x1xf32>
    %8 = math.rsqrt %7 : vector<16x1xf32>
    %c0_3 = arith.constant 0 : index
    %c0_4 = arith.constant 0 : index
    %9 = vector.load %arg2[%c0_3, %c0_4] : memref<1x32xf32, #tpu.memory_space<vmem>>, vector<1x32xf32>
    %10 = vector.broadcast %9 : vector<1x32xf32> to vector<16x32xf32>
    %11 = arith.mulf %10, %0 : vector<16x32xf32>
    %12 = vector.broadcast %8 : vector<16x1xf32> to vector<16x32xf32>
    %13 = arith.mulf %11, %12 : vector<16x32xf32>
    %c0_5 = arith.constant 0 : index
    %c0_6 = arith.constant 0 : index
    %14 = vector.load %arg3[%c0_5, %c0_6] : memref<32x96xf32, #tpu.memory_space<vmem>>, vector<32x96xf32>
    %cst_7 = arith.constant dense<0.000000e+00> : vector<16x96xf32>
    %15 = tpu.matmul %13, %14, %cst_7 {dimension_numbers = #tpu.dot_dimension_numbers<[1], [0], [0], [1], [0, 0, 1, 1], [], []>} : vector<16x32xf32>, vector<32x96xf32>, vector<16x96xf32> -> vector<16x96xf32>
    %c0_8 = arith.constant 0 : index
    %c0_9 = arith.constant 0 : index
    %16 = vector.load %arg4[%c0_8, %c0_9] : memref<1x96xf32, #tpu.memory_space<vmem>>, vector<1x96xf32>
    %17 = vector.broadcast %16 : vector<1x96xf32> to vector<16x96xf32>
    %18 = arith.addf %15, %17 : vector<16x96xf32>
    %c0_10 = arith.constant 0 : index
    %c0_11 = arith.constant 0 : index
    %19 = vector.load %arg5[%c0_10, %c0_11] : memref<16x96xf32, #tpu.memory_space<vmem>>, vector<16x96xf32>
    tpu.vector_store %arg5[%c0_10, %c0_11], %18 {strides = array<i32>} : memref<16x96xf32, #tpu.memory_space<vmem>>, vector<16x96xf32>,
    return
  }
  func.func @transform_0(%arg0: i32) -> (i32, i32) {
    %c0_i32 = arith.constant 0 : i32
    %c0_i32_0 = arith.constant 0 : i32
    return %arg0, %c0_i32 : i32, i32
  }
  func.func @transform_1(%arg0: i32) -> (i32, i32) {
    %c0_i32 = arith.constant 0 : i32
    %c0_i32_0 = arith.constant 0 : i32
    %c0_i32_1 = arith.constant 0 : i32
    return %c0_i32, %c0_i32_0 : i32, i32
  }
  func.func @transform_2(%arg0: i32) -> (i32, i32) {
    %c0_i32 = arith.constant 0 : i32
    %c0_i32_0 = arith.constant 0 : i32
    %c0_i32_1 = arith.constant 0 : i32
    return %c0_i32, %c0_i32_0 : i32, i32
  }
  func.func @transform_3(%arg0: i32) -> (i32, i32) {
    %c0_i32 = arith.constant 0 : i32
    %c0_i32_0 = arith.constant 0 : i32
    %c0_i32_1 = arith.constant 0 : i32
    return %c0_i32, %c0_i32_0 : i32, i32
  }
  func.func @transform_4(%arg0: i32) -> (i32, i32) {
    %c0_i32 = arith.constant 0 : i32
    %c0_i32_0 = arith.constant 0 : i32
    return %arg0, %c0_i32 : i32, i32
  }
}

module attributes {stable_mosaic.version = 11 : i64} {
  func.func @_attn_block_kernel(%arg0: i32, %arg1: memref<1x8x96xf32, #tpu.memory_space<vmem>>, %arg2: memref<1x8x8xf32, #tpu.memory_space<vmem>>, %arg3: memref<64x32xf32, #tpu.memory_space<vmem>>, %arg4: memref<1x32xf32, #tpu.memory_space<vmem>>, %arg5: memref<1x8x32xf32, #tpu.memory_space<vmem>>, %arg6: memref<1x8x32xf32, #tpu.memory_space<vmem>>) attributes {dimension_semantics = [#tpu.dimension_semantics<parallel>], iteration_bounds = array<i64: 2>, scalar_prefetch = 0 : i64, scratch_operands = 0 : i64, tpu.core_type = #tpu.core_type<tc>, window_params = [{transform_indices = @transform_0, window_bounds = array<i64: 1, 8, 96>}, {transform_indices = @transform_1, window_bounds = array<i64: 1, 8, 8>}, {pipeline_mode = #tpu.pipeline_mode<synchronous>, transform_indices = @transform_2, window_bounds = array<i64: 64, 32>}, {pipeline_mode = #tpu.pipeline_mode<synchronous>, transform_indices = @transform_3, window_bounds = array<i64: 1, 32>}, {transform_indices = @transform_4, window_bounds = array<i64: 1, 8, 32>}, {transform_indices = @transform_5, window_bounds = array<i64: 1, 8, 32>}]} {
    %c0 = arith.constant 0 : index
    %c0_0 = arith.constant 0 : index
    %c0_1 = arith.constant 0 : index
    %0 = vector.load %arg2[%c0, %c0_0, %c0_1] : memref<1x8x8xf32, #tpu.memory_space<vmem>>, vector<1x8x8xf32>
    %1 = vector.shape_cast %0 : vector<1x8x8xf32> to vector<8x8xf32>
    %c0_2 = arith.constant 0 : index
    %c0_3 = arith.constant 0 : index
    %c32 = arith.constant 32 : index
    %2 = vector.load %arg1[%c0_2, %c0_3, %c32] : memref<1x8x96xf32, #tpu.memory_space<vmem>>, vector<1x8x8xf32>
    %3 = vector.shape_cast %2 : vector<1x8x8xf32> to vector<8x8xf32>
    %c0_4 = arith.constant 0 : index
    %c0_5 = arith.constant 0 : index
    %c40 = arith.constant 40 : index
    %4 = vector.load %arg1[%c0_4, %c0_5, %c40] : memref<1x8x96xf32, #tpu.memory_space<vmem>>, vector<1x8x8xf32>
    %5 = vector.shape_cast %4 : vector<1x8x8xf32> to vector<8x8xf32>
    %c0_6 = arith.constant 0 : index
    %c0_7 = arith.constant 0 : index
    %c0_8 = arith.constant 0 : index
    %6 = vector.load %arg1[%c0_6, %c0_7, %c0_8] : memref<1x8x96xf32, #tpu.memory_space<vmem>>, vector<1x8x8xf32>
    %7 = vector.shape_cast %6 : vector<1x8x8xf32> to vector<8x8xf32>
    %cst = arith.constant dense<0.000000e+00> : vector<8x8xf32>
    %8 = tpu.matmul %7, %3, %cst {dimension_numbers = #tpu.dot_dimension_numbers<[1], [1], [0], [0], [0, 0, 1, 0], [], []>} : vector<8x8xf32>, vector<8x8xf32>, vector<8x8xf32> -> vector<8x8xf32>
    %9 = arith.addf %8, %1 : vector<8x8xf32>
    %cst_9 = arith.constant dense<0xFF800000> : vector<8xf32>
    %10 = vector.multi_reduction <maximumf>, %9, %cst_9 [1] : vector<8x8xf32> to vector<8xf32>
    %11 = vector.shape_cast %10 : vector<8xf32> to vector<8x1xf32>
    %12 = vector.broadcast %11 : vector<8x1xf32> to vector<8x8xf32>
    %13 = arith.subf %9, %12 : vector<8x8xf32>
    %14 = math.exp %13 : vector<8x8xf32>
    %cst_10 = arith.constant dense<0.000000e+00> : vector<8xf32>
    %15 = vector.multi_reduction <add>, %14, %cst_10 [1] : vector<8x8xf32> to vector<8xf32>
    %16 = vector.shape_cast %15 : vector<8xf32> to vector<8x1xf32>
    %cst_11 = arith.constant dense<0.000000e+00> : vector<8x8xf32>
    %17 = tpu.matmul %14, %5, %cst_11 {dimension_numbers = #tpu.dot_dimension_numbers<[1], [0], [0], [1], [0, 0, 1, 1], [], []>} : vector<8x8xf32>, vector<8x8xf32>, vector<8x8xf32> -> vector<8x8xf32>
    %18 = vector.broadcast %16 : vector<8x1xf32> to vector<8x8xf32>
    %19 = arith.divf %17, %18 : vector<8x8xf32>
    %c0_12 = arith.constant 0 : index
    %c0_13 = arith.constant 0 : index
    %c8 = arith.constant 8 : index
    %20 = vector.load %arg1[%c0_12, %c0_13, %c8] : memref<1x8x96xf32, #tpu.memory_space<vmem>>, vector<1x8x8xf32>
    %21 = vector.shape_cast %20 : vector<1x8x8xf32> to vector<8x8xf32>
    %cst_14 = arith.constant dense<0.000000e+00> : vector<8x8xf32>
    %22 = tpu.matmul %21, %3, %cst_14 {dimension_numbers = #tpu.dot_dimension_numbers<[1], [1], [0], [0], [0, 0, 1, 0], [], []>} : vector<8x8xf32>, vector<8x8xf32>, vector<8x8xf32> -> vector<8x8xf32>
    %23 = arith.addf %22, %1 : vector<8x8xf32>
    %cst_15 = arith.constant dense<0xFF800000> : vector<8xf32>
    %24 = vector.multi_reduction <maximumf>, %23, %cst_15 [1] : vector<8x8xf32> to vector<8xf32>
    %25 = vector.shape_cast %24 : vector<8xf32> to vector<8x1xf32>
    %26 = vector.broadcast %25 : vector<8x1xf32> to vector<8x8xf32>
    %27 = arith.subf %23, %26 : vector<8x8xf32>
    %28 = math.exp %27 : vector<8x8xf32>
    %cst_16 = arith.constant dense<0.000000e+00> : vector<8xf32>
    %29 = vector.multi_reduction <add>, %28, %cst_16 [1] : vector<8x8xf32> to vector<8xf32>
    %30 = vector.shape_cast %29 : vector<8xf32> to vector<8x1xf32>
    %cst_17 = arith.constant dense<0.000000e+00> : vector<8x8xf32>
    %31 = tpu.matmul %28, %5, %cst_17 {dimension_numbers = #tpu.dot_dimension_numbers<[1], [0], [0], [1], [0, 0, 1, 1], [], []>} : vector<8x8xf32>, vector<8x8xf32>, vector<8x8xf32> -> vector<8x8xf32>
    %32 = vector.broadcast %30 : vector<8x1xf32> to vector<8x8xf32>
    %33 = arith.divf %31, %32 : vector<8x8xf32>
    %c0_18 = arith.constant 0 : index
    %c0_19 = arith.constant 0 : index
    %c16 = arith.constant 16 : index
    %34 = vector.load %arg1[%c0_18, %c0_19, %c16] : memref<1x8x96xf32, #tpu.memory_space<vmem>>, vector<1x8x8xf32>
    %35 = vector.shape_cast %34 : vector<1x8x8xf32> to vector<8x8xf32>
    %cst_20 = arith.constant dense<0.000000e+00> : vector<8x8xf32>
    %36 = tpu.matmul %35, %3, %cst_20 {dimension_numbers = #tpu.dot_dimension_numbers<[1], [1], [0], [0], [0, 0, 1, 0], [], []>} : vector<8x8xf32>, vector<8x8xf32>, vector<8x8xf32> -> vector<8x8xf32>
    %37 = arith.addf %36, %1 : vector<8x8xf32>
    %cst_21 = arith.constant dense<0xFF800000> : vector<8xf32>
    %38 = vector.multi_reduction <maximumf>, %37, %cst_21 [1] : vector<8x8xf32> to vector<8xf32>
    %39 = vector.shape_cast %38 : vector<8xf32> to vector<8x1xf32>
    %40 = vector.broadcast %39 : vector<8x1xf32> to vector<8x8xf32>
    %41 = arith.subf %37, %40 : vector<8x8xf32>
    %42 = math.exp %41 : vector<8x8xf32>
    %cst_22 = arith.constant dense<0.000000e+00> : vector<8xf32>
    %43 = vector.multi_reduction <add>, %42, %cst_22 [1] : vector<8x8xf32> to vector<8xf32>
    %44 = vector.shape_cast %43 : vector<8xf32> to vector<8x1xf32>
    %cst_23 = arith.constant dense<0.000000e+00> : vector<8x8xf32>
    %45 = tpu.matmul %42, %5, %cst_23 {dimension_numbers = #tpu.dot_dimension_numbers<[1], [0], [0], [1], [0, 0, 1, 1], [], []>} : vector<8x8xf32>, vector<8x8xf32>, vector<8x8xf32> -> vector<8x8xf32>
    %46 = vector.broadcast %44 : vector<8x1xf32> to vector<8x8xf32>
    %47 = arith.divf %45, %46 : vector<8x8xf32>
    %c0_24 = arith.constant 0 : index
    %c0_25 = arith.constant 0 : index
    %c24 = arith.constant 24 : index
    %48 = vector.load %arg1[%c0_24, %c0_25, %c24] : memref<1x8x96xf32, #tpu.memory_space<vmem>>, vector<1x8x8xf32>
    %49 = vector.shape_cast %48 : vector<1x8x8xf32> to vector<8x8xf32>
    %cst_26 = arith.constant dense<0.000000e+00> : vector<8x8xf32>
    %50 = tpu.matmul %49, %3, %cst_26 {dimension_numbers = #tpu.dot_dimension_numbers<[1], [1], [0], [0], [0, 0, 1, 0], [], []>} : vector<8x8xf32>, vector<8x8xf32>, vector<8x8xf32> -> vector<8x8xf32>
    %51 = arith.addf %50, %1 : vector<8x8xf32>
    %cst_27 = arith.constant dense<0xFF800000> : vector<8xf32>
    %52 = vector.multi_reduction <maximumf>, %51, %cst_27 [1] : vector<8x8xf32> to vector<8xf32>
    %53 = vector.shape_cast %52 : vector<8xf32> to vector<8x1xf32>
    %54 = vector.broadcast %53 : vector<8x1xf32> to vector<8x8xf32>
    %55 = arith.subf %51, %54 : vector<8x8xf32>
    %56 = math.exp %55 : vector<8x8xf32>
    %cst_28 = arith.constant dense<0.000000e+00> : vector<8xf32>
    %57 = vector.multi_reduction <add>, %56, %cst_28 [1] : vector<8x8xf32> to vector<8xf32>
    %58 = vector.shape_cast %57 : vector<8xf32> to vector<8x1xf32>
    %cst_29 = arith.constant dense<0.000000e+00> : vector<8x8xf32>
    %59 = tpu.matmul %56, %5, %cst_29 {dimension_numbers = #tpu.dot_dimension_numbers<[1], [0], [0], [1], [0, 0, 1, 1], [], []>} : vector<8x8xf32>, vector<8x8xf32>, vector<8x8xf32> -> vector<8x8xf32>
    %60 = vector.broadcast %58 : vector<8x1xf32> to vector<8x8xf32>
    %61 = arith.divf %59, %60 : vector<8x8xf32>
    %c0_30 = arith.constant 0 : index
    %c0_31 = arith.constant 0 : index
    %c80 = arith.constant 80 : index
    %62 = vector.load %arg1[%c0_30, %c0_31, %c80] : memref<1x8x96xf32, #tpu.memory_space<vmem>>, vector<1x8x8xf32>
    %63 = vector.shape_cast %62 : vector<1x8x8xf32> to vector<8x8xf32>
    %c0_32 = arith.constant 0 : index
    %c0_33 = arith.constant 0 : index
    %c88 = arith.constant 88 : index
    %64 = vector.load %arg1[%c0_32, %c0_33, %c88] : memref<1x8x96xf32, #tpu.memory_space<vmem>>, vector<1x8x8xf32>
    %65 = vector.shape_cast %64 : vector<1x8x8xf32> to vector<8x8xf32>
    %c0_34 = arith.constant 0 : index
    %c0_35 = arith.constant 0 : index
    %c48 = arith.constant 48 : index
    %66 = vector.load %arg1[%c0_34, %c0_35, %c48] : memref<1x8x96xf32, #tpu.memory_space<vmem>>, vector<1x8x8xf32>
    %67 = vector.shape_cast %66 : vector<1x8x8xf32> to vector<8x8xf32>
    %cst_36 = arith.constant dense<0.000000e+00> : vector<8x8xf32>
    %68 = tpu.matmul %67, %63, %cst_36 {dimension_numbers = #tpu.dot_dimension_numbers<[1], [1], [0], [0], [0, 0, 1, 0], [], []>} : vector<8x8xf32>, vector<8x8xf32>, vector<8x8xf32> -> vector<8x8xf32>
    %69 = arith.addf %68, %1 : vector<8x8xf32>
    %cst_37 = arith.constant dense<0xFF800000> : vector<8xf32>
    %70 = vector.multi_reduction <maximumf>, %69, %cst_37 [1] : vector<8x8xf32> to vector<8xf32>
    %71 = vector.shape_cast %70 : vector<8xf32> to vector<8x1xf32>
    %72 = vector.broadcast %71 : vector<8x1xf32> to vector<8x8xf32>
    %73 = arith.subf %69, %72 : vector<8x8xf32>
    %74 = math.exp %73 : vector<8x8xf32>
    %cst_38 = arith.constant dense<0.000000e+00> : vector<8xf32>
    %75 = vector.multi_reduction <add>, %74, %cst_38 [1] : vector<8x8xf32> to vector<8xf32>
    %76 = vector.shape_cast %75 : vector<8xf32> to vector<8x1xf32>
    %cst_39 = arith.constant dense<0.000000e+00> : vector<8x8xf32>
    %77 = tpu.matmul %74, %65, %cst_39 {dimension_numbers = #tpu.dot_dimension_numbers<[1], [0], [0], [1], [0, 0, 1, 1], [], []>} : vector<8x8xf32>, vector<8x8xf32>, vector<8x8xf32> -> vector<8x8xf32>
    %78 = vector.broadcast %76 : vector<8x1xf32> to vector<8x8xf32>
    %79 = arith.divf %77, %78 : vector<8x8xf32>
    %c0_40 = arith.constant 0 : index
    %c0_41 = arith.constant 0 : index
    %c56 = arith.constant 56 : index
    %80 = vector.load %arg1[%c0_40, %c0_41, %c56] : memref<1x8x96xf32, #tpu.memory_space<vmem>>, vector<1x8x8xf32>
    %81 = vector.shape_cast %80 : vector<1x8x8xf32> to vector<8x8xf32>
    %cst_42 = arith.constant dense<0.000000e+00> : vector<8x8xf32>
    %82 = tpu.matmul %81, %63, %cst_42 {dimension_numbers = #tpu.dot_dimension_numbers<[1], [1], [0], [0], [0, 0, 1, 0], [], []>} : vector<8x8xf32>, vector<8x8xf32>, vector<8x8xf32> -> vector<8x8xf32>
    %83 = arith.addf %82, %1 : vector<8x8xf32>
    %cst_43 = arith.constant dense<0xFF800000> : vector<8xf32>
    %84 = vector.multi_reduction <maximumf>, %83, %cst_43 [1] : vector<8x8xf32> to vector<8xf32>
    %85 = vector.shape_cast %84 : vector<8xf32> to vector<8x1xf32>
    %86 = vector.broadcast %85 : vector<8x1xf32> to vector<8x8xf32>
    %87 = arith.subf %83, %86 : vector<8x8xf32>
    %88 = math.exp %87 : vector<8x8xf32>
    %cst_44 = arith.constant dense<0.000000e+00> : vector<8xf32>
    %89 = vector.multi_reduction <add>, %88, %cst_44 [1] : vector<8x8xf32> to vector<8xf32>
    %90 = vector.shape_cast %89 : vector<8xf32> to vector<8x1xf32>
    %cst_45 = arith.constant dense<0.000000e+00> : vector<8x8xf32>
    %91 = tpu.matmul %88, %65, %cst_45 {dimension_numbers = #tpu.dot_dimension_numbers<[1], [0], [0], [1], [0, 0, 1, 1], [], []>} : vector<8x8xf32>, vector<8x8xf32>, vector<8x8xf32> -> vector<8x8xf32>
    %92 = vector.broadcast %90 : vector<8x1xf32> to vector<8x8xf32>
    %93 = arith.divf %91, %92 : vector<8x8xf32>
    %c0_46 = arith.constant 0 : index
    %c0_47 = arith.constant 0 : index
    %c64 = arith.constant 64 : index
    %94 = vector.load %arg1[%c0_46, %c0_47, %c64] : memref<1x8x96xf32, #tpu.memory_space<vmem>>, vector<1x8x8xf32>
    %95 = vector.shape_cast %94 : vector<1x8x8xf32> to vector<8x8xf32>
    %cst_48 = arith.constant dense<0.000000e+00> : vector<8x8xf32>
    %96 = tpu.matmul %95, %63, %cst_48 {dimension_numbers = #tpu.dot_dimension_numbers<[1], [1], [0], [0], [0, 0, 1, 0], [], []>} : vector<8x8xf32>, vector<8x8xf32>, vector<8x8xf32> -> vector<8x8xf32>
    %97 = arith.addf %96, %1 : vector<8x8xf32>
    %cst_49 = arith.constant dense<0xFF800000> : vector<8xf32>
    %98 = vector.multi_reduction <maximumf>, %97, %cst_49 [1] : vector<8x8xf32> to vector<8xf32>
    %99 = vector.shape_cast %98 : vector<8xf32> to vector<8x1xf32>
    %100 = vector.broadcast %99 : vector<8x1xf32> to vector<8x8xf32>
    %101 = arith.subf %97, %100 : vector<8x8xf32>
    %102 = math.exp %101 : vector<8x8xf32>
    %cst_50 = arith.constant dense<0.000000e+00> : vector<8xf32>
    %103 = vector.multi_reduction <add>, %102, %cst_50 [1] : vector<8x8xf32> to vector<8xf32>
    %104 = vector.shape_cast %103 : vector<8xf32> to vector<8x1xf32>
    %cst_51 = arith.constant dense<0.000000e+00> : vector<8x8xf32>
    %105 = tpu.matmul %102, %65, %cst_51 {dimension_numbers = #tpu.dot_dimension_numbers<[1], [0], [0], [1], [0, 0, 1, 1], [], []>} : vector<8x8xf32>, vector<8x8xf32>, vector<8x8xf32> -> vector<8x8xf32>
    %106 = vector.broadcast %104 : vector<8x1xf32> to vector<8x8xf32>
    %107 = arith.divf %105, %106 : vector<8x8xf32>
    %c0_52 = arith.constant 0 : index
    %c0_53 = arith.constant 0 : index
    %c72 = arith.constant 72 : index
    %108 = vector.load %arg1[%c0_52, %c0_53, %c72] : memref<1x8x96xf32, #tpu.memory_space<vmem>>, vector<1x8x8xf32>
    %109 = vector.shape_cast %108 : vector<1x8x8xf32> to vector<8x8xf32>
    %cst_54 = arith.constant dense<0.000000e+00> : vector<8x8xf32>
    %110 = tpu.matmul %109, %63, %cst_54 {dimension_numbers = #tpu.dot_dimension_numbers<[1], [1], [0], [0], [0, 0, 1, 0], [], []>} : vector<8x8xf32>, vector<8x8xf32>, vector<8x8xf32> -> vector<8x8xf32>
    %111 = arith.addf %110, %1 : vector<8x8xf32>
    %cst_55 = arith.constant dense<0xFF800000> : vector<8xf32>
    %112 = vector.multi_reduction <maximumf>, %111, %cst_55 [1] : vector<8x8xf32> to vector<8xf32>
    %113 = vector.shape_cast %112 : vector<8xf32> to vector<8x1xf32>
    %114 = vector.broadcast %113 : vector<8x1xf32> to vector<8x8xf32>
    %115 = arith.subf %111, %114 : vector<8x8xf32>
    %116 = math.exp %115 : vector<8x8xf32>
    %cst_56 = arith.constant dense<0.000000e+00> : vector<8xf32>
    %117 = vector.multi_reduction <add>, %116, %cst_56 [1] : vector<8x8xf32> to vector<8xf32>
    %118 = vector.shape_cast %117 : vector<8xf32> to vector<8x1xf32>
    %cst_57 = arith.constant dense<0.000000e+00> : vector<8x8xf32>
    %119 = tpu.matmul %116, %65, %cst_57 {dimension_numbers = #tpu.dot_dimension_numbers<[1], [0], [0], [1], [0, 0, 1, 1], [], []>} : vector<8x8xf32>, vector<8x8xf32>, vector<8x8xf32> -> vector<8x8xf32>
    %120 = vector.broadcast %118 : vector<8x1xf32> to vector<8x8xf32>
    %121 = arith.divf %119, %120 : vector<8x8xf32>
    %122 = tpu.concatenate %19, %33, %47, %61, %79, %93, %107, %121 in 1 : vector<8x8xf32>, vector<8x8xf32>, vector<8x8xf32>, vector<8x8xf32>, vector<8x8xf32>, vector<8x8xf32>, vector<8x8xf32>, vector<8x8xf32> -> vector<8x64xf32>
    %c0_58 = arith.constant 0 : index
    %c0_59 = arith.constant 0 : index
    %123 = vector.load %arg3[%c0_58, %c0_59] : memref<64x32xf32, #tpu.memory_space<vmem>>, vector<64x32xf32>
    %cst_60 = arith.constant dense<0.000000e+00> : vector<8x32xf32>
    %124 = tpu.matmul %122, %123, %cst_60 {dimension_numbers = #tpu.dot_dimension_numbers<[1], [0], [0], [1], [0, 0, 1, 1], [], []>} : vector<8x64xf32>, vector<64x32xf32>, vector<8x32xf32> -> vector<8x32xf32>
    %c0_61 = arith.constant 0 : index
    %c0_62 = arith.constant 0 : index
    %c0_63 = arith.constant 0 : index
    %125 = vector.load %arg5[%c0_61, %c0_62, %c0_63] : memref<1x8x32xf32, #tpu.memory_space<vmem>>, vector<1x8x32xf32>
    %126 = vector.shape_cast %125 : vector<1x8x32xf32> to vector<8x32xf32>
    %127 = arith.addf %126, %124 : vector<8x32xf32>
    %c0_64 = arith.constant 0 : index
    %c0_65 = arith.constant 0 : index
    %128 = vector.load %arg4[%c0_64, %c0_65] : memref<1x32xf32, #tpu.memory_space<vmem>>, vector<1x32xf32>
    %129 = vector.broadcast %128 : vector<1x32xf32> to vector<8x32xf32>
    %130 = arith.addf %127, %129 : vector<8x32xf32>
    %c0_66 = arith.constant 0 : index
    %c0_67 = arith.constant 0 : index
    %c0_68 = arith.constant 0 : index
    %131 = vector.load %arg6[%c0_66, %c0_67, %c0_68] : memref<1x8x32xf32, #tpu.memory_space<vmem>>, vector<1x8x32xf32>
    %132 = vector.shape_cast %131 : vector<1x8x32xf32> to vector<8x32xf32>
    %133 = vector.shape_cast %130 : vector<8x32xf32> to vector<1x8x32xf32>
    tpu.vector_store %arg6[%c0_66, %c0_67, %c0_68], %133 {strides = array<i32>} : memref<1x8x32xf32, #tpu.memory_space<vmem>>, vector<1x8x32xf32>,
    return
  }
  func.func @transform_0(%arg0: i32) -> (i32, i32, i32) {
    %c0_i32 = arith.constant 0 : i32
    %c0_i32_0 = arith.constant 0 : i32
    %c0_i32_1 = arith.constant 0 : i32
    return %arg0, %c0_i32, %c0_i32_0 : i32, i32, i32
  }
  func.func @transform_1(%arg0: i32) -> (i32, i32, i32) {
    %c0_i32 = arith.constant 0 : i32
    %c0_i32_0 = arith.constant 0 : i32
    %c0_i32_1 = arith.constant 0 : i32
    return %arg0, %c0_i32, %c0_i32_0 : i32, i32, i32
  }
  func.func @transform_2(%arg0: i32) -> (i32, i32) {
    %c0_i32 = arith.constant 0 : i32
    %c0_i32_0 = arith.constant 0 : i32
    %c0_i32_1 = arith.constant 0 : i32
    return %c0_i32, %c0_i32_0 : i32, i32
  }
  func.func @transform_3(%arg0: i32) -> (i32, i32) {
    %c0_i32 = arith.constant 0 : i32
    %c0_i32_0 = arith.constant 0 : i32
    %c0_i32_1 = arith.constant 0 : i32
    return %c0_i32, %c0_i32_0 : i32, i32
  }
  func.func @transform_4(%arg0: i32) -> (i32, i32, i32) {
    %c0_i32 = arith.constant 0 : i32
    %c0_i32_0 = arith.constant 0 : i32
    %c0_i32_1 = arith.constant 0 : i32
    return %arg0, %c0_i32, %c0_i32_0 : i32, i32, i32
  }
  func.func @transform_5(%arg0: i32) -> (i32, i32, i32) {
    %c0_i32 = arith.constant 0 : i32
    %c0_i32_0 = arith.constant 0 : i32
    %c0_i32_1 = arith.constant 0 : i32
    return %arg0, %c0_i32, %c0_i32_0 : i32, i32, i32
  }
}

module attributes {stable_mosaic.version = 11 : i64} {
  func.func @_ffn_kernel(%arg0: i32, %arg1: memref<16x32xf32, #tpu.memory_space<vmem>>, %arg2: memref<1x32xf32, #tpu.memory_space<vmem>>, %arg3: memref<32x128xf32, #tpu.memory_space<vmem>>, %arg4: memref<1x128xf32, #tpu.memory_space<vmem>>, %arg5: memref<64x32xf32, #tpu.memory_space<vmem>>, %arg6: memref<1x32xf32, #tpu.memory_space<vmem>>, %arg7: memref<16x32xf32, #tpu.memory_space<vmem>>) attributes {dimension_semantics = [#tpu.dimension_semantics<parallel>], iteration_bounds = array<i64: 1>, scalar_prefetch = 0 : i64, scratch_operands = 0 : i64, tpu.core_type = #tpu.core_type<tc>, window_params = [{transform_indices = @transform_0, window_bounds = array<i64: 16, 32>}, {pipeline_mode = #tpu.pipeline_mode<synchronous>, transform_indices = @transform_1, window_bounds = array<i64: 1, 32>}, {pipeline_mode = #tpu.pipeline_mode<synchronous>, transform_indices = @transform_2, window_bounds = array<i64: 32, 128>}, {pipeline_mode = #tpu.pipeline_mode<synchronous>, transform_indices = @transform_3, window_bounds = array<i64: 1, 128>}, {pipeline_mode = #tpu.pipeline_mode<synchronous>, transform_indices = @transform_4, window_bounds = array<i64: 64, 32>}, {pipeline_mode = #tpu.pipeline_mode<synchronous>, transform_indices = @transform_5, window_bounds = array<i64: 1, 32>}, {transform_indices = @transform_6, window_bounds = array<i64: 16, 32>}]} {
    %c0 = arith.constant 0 : index
    %c0_0 = arith.constant 0 : index
    %0 = vector.load %arg1[%c0, %c0_0] : memref<16x32xf32, #tpu.memory_space<vmem>>, vector<16x32xf32>
    %1 = arith.mulf %0, %0 : vector<16x32xf32>
    %cst = arith.constant dense<0.000000e+00> : vector<16xf32>
    %2 = vector.multi_reduction <add>, %1, %cst [1] : vector<16x32xf32> to vector<16xf32>
    %3 = vector.shape_cast %2 : vector<16xf32> to vector<16x1xf32>
    %cst_1 = arith.constant 3.200000e+01 : f32
    %4 = vector.broadcast %cst_1 : f32 to vector<16x1xf32>
    %5 = arith.divf %3, %4 : vector<16x1xf32>
    %cst_2 = arith.constant 9.99999997E-7 : f32
    %6 = vector.broadcast %cst_2 : f32 to vector<16x1xf32>
    %7 = arith.addf %5, %6 : vector<16x1xf32>
    %8 = math.rsqrt %7 : vector<16x1xf32>
    %c0_3 = arith.constant 0 : index
    %c0_4 = arith.constant 0 : index
    %9 = vector.load %arg2[%c0_3, %c0_4] : memref<1x32xf32, #tpu.memory_space<vmem>>, vector<1x32xf32>
    %10 = vector.broadcast %9 : vector<1x32xf32> to vector<16x32xf32>
    %11 = arith.mulf %10, %0 : vector<16x32xf32>
    %12 = vector.broadcast %8 : vector<16x1xf32> to vector<16x32xf32>
    %13 = arith.mulf %11, %12 : vector<16x32xf32>
    %c0_5 = arith.constant 0 : index
    %c0_6 = arith.constant 0 : index
    %14 = vector.load %arg3[%c0_5, %c0_6] : memref<32x128xf32, #tpu.memory_space<vmem>>, vector<32x128xf32>
    %cst_7 = arith.constant dense<0.000000e+00> : vector<16x128xf32>
    %15 = tpu.matmul %13, %14, %cst_7 {dimension_numbers = #tpu.dot_dimension_numbers<[1], [0], [0], [1], [0, 0, 1, 1], [], []>} : vector<16x32xf32>, vector<32x128xf32>, vector<16x128xf32> -> vector<16x128xf32>
    %c0_8 = arith.constant 0 : index
    %c0_9 = arith.constant 0 : index
    %16 = vector.load %arg4[%c0_8, %c0_9] : memref<1x128xf32, #tpu.memory_space<vmem>>, vector<1x128xf32>
    %17 = vector.broadcast %16 : vector<1x128xf32> to vector<16x128xf32>
    %18 = arith.addf %15, %17 : vector<16x128xf32>
    %19 = vector.extract_strided_slice %18 {offsets = [0, 0], sizes = [16, 64], strides = [1, 1]} : vector<16x128xf32> to vector<16x64xf32>
    %20 = vector.extract_strided_slice %18 {offsets = [0, 64], sizes = [16, 64], strides = [1, 1]} : vector<16x128xf32> to vector<16x64xf32>
    %cst_10 = arith.constant 0.000000e+00 : f32
    %21 = vector.broadcast %cst_10 : f32 to vector<16x64xf32>
    %22 = arith.subf %21, %20 : vector<16x64xf32>
    %cst_11 = arith.constant 1.000000e+00 : f32
    %23 = vector.broadcast %cst_11 : f32 to vector<16x64xf32>
    %24 = arith.mulf %22, %23 : vector<16x64xf32>
    %25 = math.exp %24 : vector<16x64xf32>
    %cst_12 = arith.constant 1.000000e+00 : f32
    %26 = vector.broadcast %cst_12 : f32 to vector<16x64xf32>
    %27 = arith.addf %26, %25 : vector<16x64xf32>
    %cst_13 = arith.constant 1.000000e+00 : f32
    %28 = vector.broadcast %cst_13 : f32 to vector<16x64xf32>
    %29 = arith.divf %28, %27 : vector<16x64xf32>
    %30 = arith.mulf %20, %29 : vector<16x64xf32>
    %31 = arith.mulf %19, %30 : vector<16x64xf32>
    %c0_14 = arith.constant 0 : index
    %c0_15 = arith.constant 0 : index
    %32 = vector.load %arg5[%c0_14, %c0_15] : memref<64x32xf32, #tpu.memory_space<vmem>>, vector<64x32xf32>
    %cst_16 = arith.constant dense<0.000000e+00> : vector<16x32xf32>
    %33 = tpu.matmul %31, %32, %cst_16 {dimension_numbers = #tpu.dot_dimension_numbers<[1], [0], [0], [1], [0, 0, 1, 1], [], []>} : vector<16x64xf32>, vector<64x32xf32>, vector<16x32xf32> -> vector<16x32xf32>
    %c0_17 = arith.constant 0 : index
    %c0_18 = arith.constant 0 : index
    %34 = vector.load %arg6[%c0_17, %c0_18] : memref<1x32xf32, #tpu.memory_space<vmem>>, vector<1x32xf32>
    %35 = vector.broadcast %34 : vector<1x32xf32> to vector<16x32xf32>
    %36 = arith.addf %33, %35 : vector<16x32xf32>
    %37 = arith.addf %0, %36 : vector<16x32xf32>
    %c0_19 = arith.constant 0 : index
    %c0_20 = arith.constant 0 : index
    %38 = vector.load %arg7[%c0_19, %c0_20] : memref<16x32xf32, #tpu.memory_space<vmem>>, vector<16x32xf32>
    tpu.vector_store %arg7[%c0_19, %c0_20], %37 {strides = array<i32>} : memref<16x32xf32, #tpu.memory_space<vmem>>, vector<16x32xf32>,
    return
  }
  func.func @transform_0(%arg0: i32) -> (i32, i32) {
    %c0_i32 = arith.constant 0 : i32
    %c0_i32_0 = arith.constant 0 : i32
    return %arg0, %c0_i32 : i32, i32
  }
  func.func @transform_1(%arg0: i32) -> (i32, i32) {
    %c0_i32 = arith.constant 0 : i32
    %c0_i32_0 = arith.constant 0 : i32
    %c0_i32_1 = arith.constant 0 : i32
    return %c0_i32, %c0_i32_0 : i32, i32
  }
  func.func @transform_2(%arg0: i32) -> (i32, i32) {
    %c0_i32 = arith.constant 0 : i32
    %c0_i32_0 = arith.constant 0 : i32
    %c0_i32_1 = arith.constant 0 : i32
    return %c0_i32, %c0_i32_0 : i32, i32
  }
  func.func @transform_3(%arg0: i32) -> (i32, i32) {
    %c0_i32 = arith.constant 0 : i32
    %c0_i32_0 = arith.constant 0 : i32
    %c0_i32_1 = arith.constant 0 : i32
    return %c0_i32, %c0_i32_0 : i32, i32
  }
  func.func @transform_4(%arg0: i32) -> (i32, i32) {
    %c0_i32 = arith.constant 0 : i32
    %c0_i32_0 = arith.constant 0 : i32
    %c0_i32_1 = arith.constant 0 : i32
    return %c0_i32, %c0_i32_0 : i32, i32
  }
  func.func @transform_5(%arg0: i32) -> (i32, i32) {
    %c0_i32 = arith.constant 0 : i32
    %c0_i32_0 = arith.constant 0 : i32
    %c0_i32_1 = arith.constant 0 : i32
    return %c0_i32, %c0_i32_0 : i32, i32
  }
  func.func @transform_6(%arg0: i32) -> (i32, i32) {
    %c0_i32 = arith.constant 0 : i32
    %c0_i32_0 = arith.constant 0 : i32
    return %arg0, %c0_i32 : i32, i32
  }
}

</mosaic_0001>

<bundles_post_ra>
// kernel: _lambda_.3
= control target key start
LH: loop header
LB: loop body
LE: loop exit
PB: predicated region body
PF: predicated region fallthrough
CT: control target
= control target key end

     0   :  { %vm21_vm0 = vcmask 261120   ;;  %vm138_vm1 = vcmask 785408   ;;  %s229_s0 = inlined_call_operand.vmem [shape: f32[16,32], index: 0, kind: input, shape index: {}]   ;;  %s230_s2 = inlined_call_operand.vmem [shape: f32[32,96], index: 2, kind: input, shape index: {}]   ;;  %s231_s1 = inlined_call_operand.vmem [shape: f32[1,32], index: 1, kind: input, shape index: {}]   ;;  %s232_s3 = inlined_call_operand.vmem [shape: f32[1,96], index: 3, kind: input, shape index: {}]   ;;  %s233_s4 = inlined_call_operand.vmem [shape: f32[16,96], index: 4, kind: output, shape index: {}]  }
   0x1   :  { %v17_v0 = vld [vmem:[%s229_s0] sm:$0xff]  ;;  %v18_v1 = vld [vmem:[%s229_s0 + $0x8] sm:$0xff]  ;;  %v49_v6 = vld [vmem:[%s230_s2 + $0x18] sm:$0xff] }
   0x2   :  { %v19_v2 = vmul.f32 %v17_v0, %v17_v0  ;;  %v20_v3 = vmul.f32 %v18_v1, %v18_v1  ;;  %v48_v7 = vld [vmem:[%s230_s2 + $0x10] sm:$0xff]  ;;  %155 = vmatprep.subr.mxu0 %v49_v6  ;;  %v47_v8 = vld [vmem:[%s230_s2 + $0x8] sm:$0xff]  ;;  %v46_v9 = vld [vmem:[%s230_s2] sm:$0xff] }
   0x3   :  { %156 = vmatpush3.msra.mxu0 %v49_v6  ;;  %v145_v16 = vld [vmem:[%s231_s1] ss:$0 sm:$0xff] }
   0x4   :  { %v22_v4 = vsel %vm21_vm0, %v19_v2, 0.0  ;;  %v25_v5 = vsel %vm21_vm0, %v20_v3, 0.0  ;;  %157 = vmatprep.subr.mxu0 %v48_v7  ;;  %v42_v17 = vmul.f32 %v145_v16, %v17_v0  ;;  %v43_v19 = vmul.f32 %v145_v16, %v18_v1  ;;  %v146_v23 = vld [vmem:[%s232_s3] ss:$0 sm:$0xff] }
   0x5   :  { %23 = vadd.xlane.f32.xlu0 %v22_v4  ;;  %158 = vmatpush3.msra.mxu0 %v48_v7 }
   0x6   :  { %159 = vmatprep.subr.mxu0 %v47_v8 }
   0x7   :  { %160 = vmatpush3.msra.mxu0 %v47_v8 }
   0x8   :  { %161 = vmatprep.subr.mxu0 %v46_v9 }
   0x9   :  { %26 = vadd.xlane.f32.xlu0 %v25_v5  ;;  %162 = vmatpush3.msra.mxu0 %v46_v9 }
  0x8e   :  { %v24_v10 = vpop.xlane.xlu0 %23 }
  0x8f   :  { %v29_v11 = vmul.f32 0.03125, %v24_v10 }
  0x91   :  { %v31_v12 = vadd.f32 1e-06, %v29_v11 }
  0x92   :  { %v27_v13 = vpop.xlane.xlu0 %26 }
  0x93   :  { %166 = vrsqrt.f32 %v31_v12  ;;  %v30_v14 = vmul.f32 0.03125, %v27_v13 }
  0x95   :  { %v32_v15 = vadd.f32 1e-06, %v30_v14 }
  0x97   :  { %168 = vrsqrt.f32 %v32_v15 }
  0xa0   :  { %v167_v18 = vpop.eup %166 }
  0xa1   :  { %v44_v20 = vmul.f32 %v167_v18, %v42_v17 }
  0xa3   :  { %163 = vmatprep.mubr.msk.f32.mxu0 %vm21_vm0, %v44_v20 }
  0xa4   :  { %v169_v21 = vpop.eup %168 }
  0xa5   :  { %v45_v22 = vmul.f32 %v169_v21, %v43_v19 }
  0xa7   :  { %164 = vmatmul.mubr.msk.f32.vlgmr.msra.gmra.mxu0 %vm21_vm0, %v45_v22 }
 0x167   :  { %v165_v24 = vpop.f32.mrf.mxu0 }
 0x168   :  { %v135_v25 = vadd.f32 %v165_v24, %v146_v23 }
 0x169   :  { %v129_v26 = vpop.f32.mrf.mxu0 }
 0x16a   :  { %140 = vst.msk [vmem:[%s233_s4 + $0x8] sm:$0xff] %vm138_vm1, %v135_v25  ;;  %v130_v27 = vadd.f32 %v146_v23, %v129_v26 }
 0x16c   :  { %139 = vst.msk [vmem:[%s233_s4] sm:$0xff] %vm138_vm1, %v130_v27 }

// kernel: _lambda_.5
= control target key start
LH: loop header
LB: loop body
LE: loop exit
PB: predicated region body
PF: predicated region fallthrough
CT: control target
= control target key end

     0   :  { %vm28_vm0 = vcmask 261120   ;;  %s488_s0 = inlined_call_operand.vmem [shape: f32[16,32], index: 0, kind: input, shape index: {}]   ;;  %s489_s1 = inlined_call_operand.vmem [shape: f32[1,32], index: 1, kind: input, shape index: {}]   ;;  %s490_s2 = inlined_call_operand.vmem [shape: f32[32,128], index: 2, kind: input, shape index: {}]   ;;  %s491_s3 = inlined_call_operand.vmem [shape: f32[1,128], index: 3, kind: input, shape index: {}]   ;;  %s492_s4 = inlined_call_operand.vmem [shape: f32[64,32], index: 4, kind: input, shape index: {}]   ;;  %s493_s5 = inlined_call_operand.vmem [shape: f32[1,32], index: 5, kind: input, shape index: {}]   ;;  %s494_s6 = inlined_call_operand.hbm [shape: f32[16,32], index: 6, kind: output, shape index: {}]  }
   0x1   :  { %v419_v0 = vld [vmem:[%s488_s0] sm:$0xff]  ;;  %v424_v1 = vld [vmem:[%s488_s0 + $0x8] sm:$0xff] }
   0x2   :  { %11 = vsyncpa [#allocation3], 0  ;;  %v26_v2 = vmul.f32 %v419_v0, %v419_v0  ;;  %v27_v3 = vmul.f32 %v424_v1, %v424_v1  ;;  %v56_v6 = vld [vmem:[%s490_s2 + $0x18] sm:$0xff]  ;;  %v55_v7 = vld [vmem:[%s490_s2 + $0x10] sm:$0xff]  ;;  %s377_s25 = smov 64   ;;  %vm184_vm1 = vcmask 523264  }
   0x3   :  { %309 = vmatprep.subr.mxu0 %v56_v6  ;;  %v54_v8 = vld [vmem:[%s490_s2 + $0x8] sm:$0xff]  ;;  %v53_v9 = vld [vmem:[%s490_s2] sm:$0xff]  ;;  %v176_v23 = vld [vmem:[%s492_s4 + $0x38] sm:$0xff] }
   0x4   :  { %v29_v4 = vsel %vm28_vm0, %v26_v2, 0.0  ;;  %v32_v5 = vsel %vm28_vm0, %v27_v3, 0.0  ;;  %310 = vmatpush3.msra.mxu0 %v56_v6  ;;  %v286_v16 = vld [vmem:[%s489_s1] ss:$0 sm:$0xff]  ;;  %v175_v24 = vld [vmem:[%s492_s4 + $0x30] sm:$0xff]  ;;  %320 = vmatprep.subr.mxu1 %v176_v23  ;;  %v174_v25 = vld [vmem:[%s492_s4 + $0x28] sm:$0xff] }
   0x5   :  { %30 = vadd.xlane.f32.xlu0 %v29_v4  ;;  %311 = vmatprep.subr.mxu0 %v55_v7  ;;  %v49_v17 = vmul.f32 %v286_v16, %v419_v0  ;;  %v50_v19 = vmul.f32 %v286_v16, %v424_v1  ;;  %v173_v26 = vld [vmem:[%s492_s4 + $0x20] sm:$0xff]  ;;  %v172_v27 = vld [vmem:[%s492_s4 + $0x18] sm:$0xff]  ;;  %v171_v41 = vld [vmem:[%s492_s4 + $0x10] sm:$0xff] }
   0x6   :  { %312 = vmatpush3.msra.mxu0 %v55_v7  ;;  %321 = vmatpush3.msra.mxu1 %v176_v23  ;;  %v287_v28 = vld [vmem:[%s491_s3] ss:$0 sm:$0xff]  ;;  %v170_v42 = vld [vmem:[%s492_s4 + $0x8] sm:$0xff] }
   0x7   :  { %313 = vmatprep.subr.mxu0 %v54_v8  ;;  %322 = vmatprep.subr.mxu1 %v175_v24  ;;  %v169_v43 = vld [vmem:[%s492_s4] sm:$0xff]  ;;  %s378_s4 = smov [#allocation2]  }
   0x8   :  { %314 = vmatpush3.msra.mxu0 %v54_v8  ;;  %323 = vmatpush3.msra.mxu1 %v175_v24  ;;  %v290_v52 = vld [vmem:[%s493_s5] ss:$0 sm:$0xff]  ;;  %s275_s0 = sshll.u32 %s378_s4, 4  ;;  %s276_s0 = int_to_ptr.vmem [resolvable:$true] %s275_s0 }
   0x9   :  { %33 = vadd.xlane.f32.xlu0 %v32_v5  ;;  %315 = vmatprep.subr.mxu0 %v53_v9  ;;  %s355_s28 = scalar_lea.vmem %s276_s0, 256  ;;  %p360_p1 = scmp.lt.s32.totalorder %s276_s0, %s276_s0 }
   0xa   :  { %316 = vmatpush3.msra.mxu0 %v53_v9  ;;  %324 = vmatprep.subr.mxu1 %v174_v25  ;;  %p356_p0 = scmp.ne.s32.totalorder %s276_s0, %s355_s28  ;;  %p361_p2 = scmp.lt.s32.totalorder %s355_s28, %s355_s28 }
   0xb   :  { %325 = vmatpush3.msra.mxu1 %v174_v25 }
   0xc   :  { %326 = vmatprep.subr.mxu1 %v173_v26  ;;  %p362_p3 = por %p361_p2, %p360_p1 }
   0xd   :  { %327 = vmatpush3.msra.mxu1 %v173_v26 }
   0xe   :  { %328 = vmatprep.subr.mxu1 %v172_v27  ;;  %p363_p4 = pnand %p362_p3, %p356_p0 }
   0xf   :  { %329 = vmatpush3.msra.mxu1 %v172_v27 }
  0x10   :  { %330 = vmatprep.subr.mxu1 %v171_v41 }
  0x11   :  { %331 = vmatpush3.msra.mxu1 %v171_v41 }
  0x12   :  { %332 = vmatprep.subr.mxu1 %v170_v42 }
  0x13   :  { %333 = vmatpush3.msra.mxu1 %v170_v42 }
  0x14   :  { %334 = vmatprep.subr.mxu1 %v169_v43 }
  0x15   :  { %335 = vmatpush3.msra.mxu1 %v169_v43 }
  0x8e   :  { %v31_v10 = vpop.xlane.xlu0 %30 }
  0x8f   :  { %v36_v11 = vmul.f32 0.03125, %v31_v10 }
  0x91   :  { %v38_v12 = vadd.f32 1e-06, %v36_v11 }
  0x92   :  { %v34_v13 = vpop.xlane.xlu0 %33 }
  0x93   :  { %343 = vrsqrt.f32 %v38_v12  ;;  %v37_v14 = vmul.f32 0.03125, %v34_v13 }
  0x95   :  { %v39_v15 = vadd.f32 1e-06, %v37_v14 }
  0x97   :  { %345 = vrsqrt.f32 %v39_v15 }
  0xa0   :  { %v344_v18 = vpop.eup %343 }
  0xa1   :  { %v51_v20 = vmul.f32 %v344_v18, %v49_v17 }
  0xa3   :  { %317 = vmatprep.mubr.msk.f32.mxu0 %vm28_vm0, %v51_v20 }
  0xa4   :  { %v346_v21 = vpop.eup %345 }
  0xa5   :  { %v52_v22 = vmul.f32 %v346_v21, %v50_v19 }
  0xa7   :  { %318 = vmatmul.mubr.msk.f32.vlgmr.msra.gmra.mxu0 %vm28_vm0, %v52_v22 }
 0x167   :  { %v319_v29 = vpop.f32.mrf.mxu0 }
 0x168   :  { %v142_v30 = vadd.f32 %v319_v29, %v287_v28 }
 0x169   :  { %v136_v31 = vpop.f32.mrf.mxu0 }
 0x16a   :  { %v146_v32 = vsub.f32 0.0, %v142_v30  ;;  %v137_v33 = vadd.f32 %v287_v28, %v136_v31 }
 0x16c   :  { %v149_v34 = vmul.f32 1.442695, %v146_v32  ;;  %v145_v35 = vsub.f32 0.0, %v137_v33 }
 0x16e   :  { %347 = vpow2.f32 %v149_v34  ;;  %v147_v36 = vmul.f32 1.442695, %v145_v35 }
 0x170   :  { %349 = vpow2.f32 %v147_v36 }
 0x17b   :  { %v348_v37 = vpop.eup %347 }
 0x17c   :  { %v152_v39 = vadd.f32 1.0, %v348_v37 }
 0x17d   :  { %v350_v38 = vpop.eup %349 }
 0x17e   :  { %v151_v40 = vadd.f32 1.0, %v350_v38 }
 0x180   :  { %351 = vrcp.f32 %v151_v40 }
 0x181   :  { %353 = vrcp.f32 %v152_v39 }
 0x18d   :  { %v352_v44 = vpop.eup %351 }
 0x18e   :  { %v157_v45 = vmul.f32 %v352_v44, %v137_v33  ;;  %v354_v46 = vpop.eup %353 }
 0x18f   :  { %v158_v47 = vmul.f32 %v354_v46, %v142_v30 }
 0x190   :  { %161 = vrot.lane.b32.xlu1 %v157_v45, %s377_s25 }
 0x194   :  { %163 = vrot.lane.b32.xlu1 %v158_v47, %s377_s25 }
 0x202   :  { %v162_v48 = vpop.permute.xlu1 %161 }
 0x203   :  { %v167_v49 = vmul.f32 %v162_v48, %v137_v33 }
 0x205   :  { %336 = vmatprep.mubr.msk.f32.mxu1 %vm184_vm1, %v167_v49 }
 0x206   :  { %v164_v50 = vpop.permute.xlu1 %163 }
 0x207   :  { %v168_v51 = vmul.f32 %v164_v50, %v142_v30 }
 0x209   :  { %337 = vmatmul.mubr.msk.f32.vlgmr.msra.gmra.mxu1 %vm184_vm1, %v168_v51 }
 0x2c9   :  { %v338_v53 = vpop.f32.mrf.mxu1 }
 0x2ca   :  { %v263_v54 = vadd.f32 %v338_v53, %v290_v52 }
 0x2cb   :  { %v257_v55 = vpop.f32.mrf.mxu1 }
 0x2cc   :  { %v267_v56 = vadd.f32 %v263_v54, %v424_v1  ;;  %v258_v57 = vadd.f32 %v290_v52, %v257_v55 }
 0x2ce   :  { %269 = vst.msk [vmem:[#allocation2 + $0x8] sm:$0xff] %vm28_vm0, %v267_v56  ;;  %v266_v58 = vadd.f32 %v258_v57, %v419_v0 }
 0x2d0   :  { %268 = vst.msk [vmem:[#allocation2] sm:$0xff] %vm28_vm0, %v266_v58 }
 0x2d1   :  { %366 = shalt.err (!%p363_p4)
}
 0x2d2   :  { %s379_s5 = smov 128   ;;  %s380_s29 = smov 8  }
 0x2d3   :  { %281 = dma.vmem_to_hbm [thread:$0]  %s276_s0, 256, %s494_s6, [#allocation3], %s379_s5, %s379_s5, %s380_s29  }
 0x2d4   :  { %375 = dma.done.wait [#allocation3], 256  }
 0x2d5   :  { %376 = vsyncadd [#allocation3], 4294967040 }
 0x2d6   :  { %285 = vsyncpa [#allocation3], 1 }

// kernel: _lambda_.4
= control target key start
LH: loop header
LB: loop body
LE: loop exit
PB: predicated region body
PF: predicated region fallthrough
CT: control target
= control target key end

     0   :  { %s2034_s18 = smov 0   ;;  %s2243_s0 = inlined_call_operand.vmem [shape: f32[2,8,96], index: 0, kind: input, shape index: {}]   ;;  %s2244_s1 = inlined_call_operand.vmem [shape: f32[2,8,8], index: 1, kind: input, shape index: {}]   ;;  %s2245_s2 = inlined_call_operand.vmem [shape: f32[64,32], index: 2, kind: input, shape index: {}]   ;;  %s2246_s3 = inlined_call_operand.vmem [shape: f32[1,32], index: 3, kind: input, shape index: {}]   ;;  %s2247_s4 = inlined_call_operand.vmem [shape: f32[2,8,32], index: 4, kind: input, shape index: {}]   ;;  %s2248_s5 = inlined_call_operand.vmem [shape: f32[2,8,32], index: 5, kind: output, shape index: {}]  }
   0x1 LB: > { %s1745_s19 = sadd.s32 4294967295, %s1985_s18   ;;  %p1749_p0 = scmp.ge.s32.totalorder %s1985_s18, 1  ;;  %s1985_s18 = sphi %s2034_s18, %s15_s18  }
   0x2   : > { %p204_p1 = scmp.lt.s32.totalorder %s1985_s18, 3 }
   0x4   : > { %p205_p2 = pnand %p1749_p0, %p204_p1 }
   0x5   : > { %p238_p3 = scmp.lt.s32.totalorder (!%p205_p2), %s1745_s19, 1  ;;  %s1989_s24 = smov (!%p205_p2), 88  }
   0x6   : > { %208 = sbr.rel (%p205_p2) target bundleno = 1374 (0x55e), region = 40  ;;  %s1990_s25 = smov (!%p205_p2), 96  }
   0x7   : > { %s1991_s26 = smov (!%p205_p2), 120   ;;  %s1992_s27 = smov (!%p205_p2), 112  }
   0x8   : > { %s1993_s28 = smov (!%p205_p2), 104   ;;  %s1994_s29 = smov (!%p205_p2), 48  }
   0x9   : > { %s1995_s30 = smov (!%p205_p2), 80   ;;  %s1996_s6 = smov (!%p205_p2), 72  }
   0xa   : > { %s1997_s7 = smov (!%p205_p2), 64   ;;  %s1998_s8 = smov (!%p205_p2), 56  }
   0xb   : > { %v1987_v0 = vmov 0.0   ;;  %s2250_s19 = smov (!%p238_p3, %s1745_s19), 1  ;;  %vm1988_vm0 = vmmov 0   ;;  %vm259_vm1 = vcmask 64512   ;;  %s1999_s12 = smov 40   ;;  %vm1563_vm2 = vcmask 130048  }
   0xc   : > { %1823 = vmatprep.subr.mxu0 %v1987_v0  ;;  %1843 = vmatprep.subr.mxu1 %v1987_v0  ;;  %s2048_s20 = sshll.u32 %s2250_s19, 3  ;;  %s2000_s21 = smov 8   ;;  %vm1565_vm3 = vcmask 195584   ;;  %vm1567_vm4 = vcmask 261120   ;;  %vm1569_vm5 = vcmask 326656   ;;  %vm1571_vm6 = vcmask 392192  }
   0xd   : > { %1825 = vmatprep.mubr.msk.f32.mxu0 %vm1988_vm0, %v1987_v0  ;;  %1845 = vmatprep.mubr.msk.f32.mxu1 %vm1988_vm0, %v1987_v0  ;;  %s241_s23 = scalar_lea.vmem %s2243_s0, %s2048_s20  ;;  %s245_s11 = scalar_lea.vmem %s2244_s1, %s2048_s20  ;;  %vm1573_vm7 = vcmask 457728   ;;  %vm1583_vm8 = vcmask 523264  }
   0xe   : > { %v2054_v1 = vld [vmem:[%s241_s23] sm:$0xff]  ;;  %s253_s17 = scalar_lea.vmem %s2248_s5, %s2048_s20 }
   0xf   : > { %343 = vrot.lane.b32.xlu1 %v2054_v1, %s1989_s24  ;;  %257 = vrot.lane.b32.xlu0 %v2054_v1, %s1990_s25  ;;  %v2106_v9 = vld [vmem:[%s245_s11] sm:$0xff]  ;;  %s2003_s11 = smov 32  }
  0x13   : > { %421 = vrot.lane.b32.xlu1 %v2054_v1, %s1991_s26  ;;  %s2001_s26 = smov 16  }
  0x17   : > { %579 = vrot.lane.b32.xlu1 %v2054_v1, %s1992_s27 }
  0x1b   : > { %737 = vrot.lane.b32.xlu1 %v2054_v1, %s1993_s28 }
  0x1f   : > { %897 = vrot.lane.b32.xlu1 %v2054_v1, %s1994_s29 }
  0x23   : > { %895 = vrot.lane.b32.xlu1 %v2054_v1, %s1995_s30 }
  0x27   : > { %1060 = vrot.lane.b32.xlu1 %v2054_v1, %s1996_s6 }
  0x2b   : > { %1218 = vrot.lane.b32.xlu1 %v2054_v1, %s1997_s7  ;;  %s2002_s7 = smov 24  }
  0x2f   : > { %1376 = vrot.lane.b32.xlu1 %v2054_v1, %s1998_s8 }
  0x81   : > { %v2064_v2 = vpop.permute.xlu1 %343  ;;  %v2066_v3 = vpop.permute.xlu0 %257 }
  0x82   : > { %1824 = vmatpush3.xpose.msk.msra.mxu0 %vm259_vm1, %v2066_v3  ;;  %1844 = vmatpush3.xpose.msk.msra.mxu1 %vm259_vm1, %v2066_v3 }
  0x83   : > { %1853 = vmatprep.subr.mxu1 %v1987_v0  ;;  %1828 = vmatprep.subr.mxu0 %v1987_v0 }
  0x85   : > { %v2074_v4 = vpop.permute.xlu1 %421  ;;  %1826 = vmatmul.mubr.msk.f32.vlgmr.msra.gmra.mxu0 %vm259_vm1, %v2054_v1 }
  0x86   : > { %1829 = vmatpush3.msra.mxu0 %v2064_v2  ;;  %1830 = vmatprep.mubr.msk.f32.mxu0 %vm1988_vm0, %v1987_v0 }
  0x87   : > { %1833 = vmatprep.subr.mxu0 %v1987_v0 }
  0x89   : > { %v580_v5 = vpop.permute.xlu1 %579 }
  0x8a   : > { %1846 = vmatmul.mubr.msk.f32.vlgmr.msra.gmra.mxu1 %vm259_vm1, %v580_v5 }
  0x8b   : > { %1854 = vmatpush3.xpose.msk.msra.mxu1 %vm259_vm1, %v2066_v3  ;;  %1855 = vmatprep.mubr.msk.f32.mxu1 %vm1988_vm0, %v1987_v0 }
  0x8c   : > { %1863 = vmatprep.subr.mxu1 %v1987_v0 }
  0x8d   : > { %v738_v6 = vpop.permute.xlu1 %737 }
  0x8e   : > { %1856 = vmatmul.mubr.msk.f32.vlgmr.msra.gmra.mxu1 %vm259_vm1, %v738_v6 }
  0x8f   : > { %1865 = vmatprep.mubr.msk.f32.mxu1 %vm1988_vm0, %v1987_v0 }
  0x91   : > { %v898_v7 = vpop.permute.xlu1 %897 }
  0x92   : > { %1864 = vmatpush3.xpose.msk.msra.mxu1 %vm259_vm1, %v898_v7 }
  0x93   : > { %1873 = vmatprep.subr.mxu1 %v1987_v0 }
  0x95   : > { %v896_v8 = vpop.permute.xlu1 %895 }
  0x96   : > { %1866 = vmatmul.mubr.msk.f32.vlgmr.msra.gmra.mxu1 %vm259_vm1, %v896_v8 }
  0x97   : > { %1874 = vmatpush3.xpose.msk.msra.mxu1 %vm259_vm1, %v898_v7  ;;  %1875 = vmatprep.mubr.msk.f32.mxu1 %vm1988_vm0, %v1987_v0 }
  0x98   : > { %1883 = vmatprep.subr.mxu1 %v1987_v0 }
  0x99   : > { %v1061_v14 = vpop.permute.xlu1 %1060 }
  0x9a   : > { %1876 = vmatmul.mubr.msk.f32.vlgmr.msra.gmra.mxu1 %vm259_vm1, %v1061_v14 }
  0x9b   : > { %1884 = vmatpush3.xpose.msk.msra.mxu1 %vm259_vm1, %v898_v7  ;;  %1885 = vmatprep.mubr.msk.f32.mxu1 %vm1988_vm0, %v1987_v0 }
  0x9c   : > { %1893 = vmatprep.subr.mxu1 %v1987_v0 }
  0x9d   : > { %v1219_v15 = vpop.permute.xlu1 %1218 }
  0x9e   : > { %1886 = vmatmul.mubr.msk.f32.vlgmr.msra.gmra.mxu1 %vm259_vm1, %v1219_v15 }
  0x9f   : > { %1894 = vmatpush3.xpose.msk.msra.mxu1 %vm259_vm1, %v898_v7  ;;  %1895 = vmatprep.mubr.msk.f32.mxu1 %vm1988_vm0, %v1987_v0 }
  0xa0   : > { %1903 = vmatprep.subr.mxu1 %v1987_v0 }
  0xa1   : > { %v1377_v16 = vpop.permute.xlu1 %1376 }
  0xa2   : > { %1896 = vmatmul.mubr.msk.f32.vlgmr.msra.gmra.mxu1 %vm259_vm1, %v1377_v16 }
  0xa3   : > { %1919 = vmatprep.mubr.msk.f32.mxu1 %vm1988_vm0, %v1987_v0 }
 0x145   : > { %v330_v10 = vpop.f32.mrf.mxu0 }
 0x146   : > { %v331_v11 = vadd.f32 %v330_v10, %v2106_v9 }
 0x147   : > { %v1827_v12 = vpop.f32.mrf.mxu0 }
 0x148   : > { %v334_v13 = vsel %vm259_vm1, %v331_v11, -inf }
 0x149   : > { %335 = vmax.xlane.f32.xlu0 %v334_v13 }
 0x14a   : > { %v649_v17 = vpop.f32.mrf.mxu1 }
 0x14b   : > { %v650_v18 = vadd.f32 %v649_v17, %v2106_v9 }
 0x14c   : > { %v1847_v19 = vpop.f32.mrf.mxu1 }
 0x14d   : > { %v653_v20 = vsel %vm259_vm1, %v650_v18, -inf }
 0x14e   : > { %654 = vmax.xlane.f32.xlu1 %v653_v20  ;;  %v807_v21 = vpop.f32.mrf.mxu1 }
 0x14f   : > { %v808_v22 = vadd.f32 %v807_v21, %v2106_v9 }
 0x150   : > { %v1857_v23 = vpop.f32.mrf.mxu1 }
 0x151   : > { %v811_v24 = vsel %vm259_vm1, %v808_v22, -inf }
 0x152   : > { %812 = vmax.xlane.f32.xlu0 %v811_v24 }
 0x156   : > { %v969_v25 = vpop.f32.mrf.mxu1 }
 0x157   : > { %v970_v26 = vadd.f32 %v969_v25, %v2106_v9 }
 0x158   : > { %v1867_v27 = vpop.f32.mrf.mxu1 }
 0x159   : > { %v973_v28 = vsel %vm259_vm1, %v970_v26, -inf }
 0x15a   : > { %974 = vmax.xlane.f32.xlu0 %v973_v28  ;;  %v1130_v40 = vpop.f32.mrf.mxu1 }
 0x15b   : > { %v1131_v53 = vadd.f32 %v1130_v40, %v2106_v9 }
 0x15c   : > { %v1877_v42 = vpop.f32.mrf.mxu1 }
 0x15d   : > { %v1134_v57 = vsel %vm259_vm1, %v1131_v53, -inf  ;;  %v1579_v42 = vld [vmem:[%s2245_s2 + $0x20] sm:$0xff] }
 0x15e   : > { %v1288_v44 = vpop.f32.mrf.mxu1 }
 0x15f   : > { %v1289_v56 = vadd.f32 %v1288_v44, %v2106_v9 }
 0x160   : > { %v1887_v45 = vpop.f32.mrf.mxu1 }
 0x161   : > { %v1292_v59 = vsel %vm259_vm1, %v1289_v56, -inf }
 0x162   : > { %v1446_v47 = vpop.f32.mrf.mxu1 }
 0x163   : > { %v1447_v58 = vadd.f32 %v1446_v47, %v2106_v9 }
 0x164   : > { %v1897_v48 = vpop.f32.mrf.mxu1 }
 0x165   : > { %v1450_v60 = vsel %vm259_vm1, %v1447_v58, -inf }
 0x1d2   : > { %v336_v29 = vpop.xlane.xlu0 %335 }
 0x1d3   : > { %v337_v30 = vsub.f32 %v331_v11, %v336_v29 }
 0x1d5   : > { %v338_v31 = vmul.f32 1.442695, %v337_v30  ;;  %v1582_v30 = vld [vmem:[%s2245_s2 + $0x38] sm:$0xff] }
 0x1d6   : > { %1904 = vmatpush3.msra.mxu1 %v1582_v30 }
 0x1d7   : > { %1947 = vpow2.f32 %v338_v31  ;;  %v655_v33 = vpop.xlane.xlu1 %654  ;;  %1905 = vmatprep.subr.mxu1 %v1987_v0 }
 0x1d8   : > { %v656_v34 = vsub.f32 %v650_v18, %v655_v33 }
 0x1da   : > { %v657_v36 = vmul.f32 1.442695, %v656_v34 }
 0x1db   : > { %v813_v35 = vpop.xlane.xlu0 %812 }
 0x1dc   : > { %v814_v37 = vsub.f32 %v808_v22, %v813_v35  ;;  %1949 = vpow2.f32 %v657_v36  ;;  %v1581_v36 = vld [vmem:[%s2245_s2 + $0x30] sm:$0xff] }
 0x1dd   : > { %1906 = vmatpush3.msra.mxu1 %v1581_v36 }
 0x1de   : > { %v815_v38 = vmul.f32 1.442695, %v814_v37  ;;  %v1580_v37 = vld [vmem:[%s2245_s2 + $0x28] sm:$0xff]  ;;  %1907 = vmatprep.subr.mxu1 %v1987_v0 }
 0x1df   : > { %1908 = vmatpush3.msra.mxu1 %v1580_v37 }
 0x1e0   : > { %1951 = vpow2.f32 %v815_v38  ;;  %1909 = vmatprep.subr.mxu1 %v1987_v0 }
 0x1e1   : > { %1910 = vmatpush3.msra.mxu1 %v1579_v42 }
 0x1e2   : > { %1911 = vmatprep.subr.mxu1 %v1987_v0 }
 0x1e3   : > { %v975_v61 = vpop.xlane.xlu0 %974 }
 0x1e4   : > { %v2129_v32 = vpop.eup %1947  ;;  %v976_v62 = vsub.f32 %v970_v26, %v975_v61 }
 0x1e5   : > { %1831 = vmatmul.mubr.msk.f32.vlgmr.msra.gmra.mxu0 %vm259_vm1, %v2129_v32  ;;  %v340_v24 = vsel %vm259_vm1, %v2129_v32, 0.0 }
 0x1e6   : > { %1834 = vmatpush3.xpose.msk.msra.mxu0 %vm259_vm1, %v2066_v3  ;;  %1835 = vmatprep.mubr.msk.f32.mxu0 %vm1988_vm0, %v1987_v0  ;;  %v977_v63 = vmul.f32 1.442695, %v976_v62 }
 0x1e7   : > { %1838 = vmatprep.subr.mxu0 %v1987_v0 }
 0x1e8   : > { %1953 = vpow2.f32 %v977_v63 }
 0x1e9   : > { %1836 = vmatmul.mubr.msk.f32.vlgmr.msra.gmra.mxu0 %vm259_vm1, %v2074_v4  ;;  %v1950_v39 = vpop.eup %1949 }
 0x1ea   : > { %1839 = vmatpush3.msra.mxu0 %v2064_v2  ;;  %1840 = vmatprep.mubr.msk.f32.mxu0 %vm1988_vm0, %v1987_v0  ;;  %v659_v41 = vsel %vm259_vm1, %v1950_v39, 0.0 }
 0x1eb   : > { %1848 = vmatprep.subr.mxu0 %v1987_v0  ;;  %660 = vadd.xlane.f32.xlu1 %v659_v41 }
 0x1ed   : > { %v1952_v43 = vpop.eup %1951 }
 0x1ee   : > { %v817_v46 = vsel %vm259_vm1, %v1952_v43, 0.0 }
 0x1ef   : > { %818 = vadd.xlane.f32.xlu1 %v817_v46 }
 0x1f5   : > { %v1954_v3 = vpop.eup %1953 }
 0x1f6   : > { %v979_v4 = vsel %vm259_vm1, %v1954_v3, 0.0 }
 0x274   : > { %v661_v25 = vpop.xlane.xlu1 %660 }
 0x278   : > { %v819_v26 = vpop.xlane.xlu1 %818 }
 0x2a5   : > { %v2146_v49 = vpop.f32.mrf.mxu0 }
 0x2a7   : > { %v1832_v50 = vpop.f32.mrf.mxu0 }
 0x2a8   : > { %v1577_v50 = vld [vmem:[%s2245_s2 + $0x10] sm:$0xff] }
 0x2a9   : > { %v491_v51 = vpop.f32.mrf.mxu0 }
 0x2aa   : > { %v492_v52 = vadd.f32 %v491_v51, %v2106_v9  ;;  %v1576_v51 = vld [vmem:[%s2245_s2 + $0x8] sm:$0xff] }
 0x2ab   : > { %v1837_v54 = vpop.f32.mrf.mxu0 }
 0x2ac   : > { %v495_v55 = vsel %vm259_vm1, %v492_v52, -inf }
 0x2ad   : > { %496 = vmax.xlane.f32.xlu0 %v495_v55 }
 0x2b1   : > { %1135 = vmax.xlane.f32.xlu0 %v1134_v57 }
 0x2b5   : > { %1293 = vmax.xlane.f32.xlu0 %v1292_v59 }
 0x2b9   : > { %1451 = vmax.xlane.f32.xlu0 %v1450_v60 }
 0x2cf   : > { %982 = vrot.lane.b32.xlu0 %v2054_v1, %s1999_s12 }
 0x2ee   : > { %980 = vadd.xlane.f32.xlu0 %v979_v4 }
 0x336   : > { %v497_v5 = vpop.xlane.xlu0 %496 }
 0x337   : > { %v498_v6 = vsub.f32 %v492_v52, %v497_v5 }
 0x339   : > { %v499_v7 = vmul.f32 1.442695, %v498_v6 }
 0x33a   : > { %v1136_v8 = vpop.xlane.xlu0 %1135 }
 0x33b   : > { %1955 = vpow2.f32 %v499_v7  ;;  %v1137_v9 = vsub.f32 %v1131_v53, %v1136_v8 }
 0x33d   : > { %v1138_v10 = vmul.f32 1.442695, %v1137_v9 }
 0x33e   : > { %v1294_v11 = vpop.xlane.xlu0 %1293 }
 0x33f   : > { %1957 = vpow2.f32 %v1138_v10  ;;  %v1295_v12 = vsub.f32 %v1289_v56, %v1294_v11  ;;  %v1575_v56 = vld [vmem:[%s2245_s2] sm:$0xff] }
 0x341   : > { %v1296_v13 = vmul.f32 1.442695, %v1295_v12 }
 0x342   : > { %v1452_v1 = vpop.xlane.xlu0 %1451 }
 0x343   : > { %v1453_v14 = vsub.f32 %v1447_v58, %v1452_v1  ;;  %1959 = vpow2.f32 %v1296_v13 }
 0x345   : > { %v1454_v15 = vmul.f32 1.442695, %v1453_v14 }
 0x346   : > { %v983_v19 = vpop.permute.xlu0 %982 }
 0x347   : > { %1961 = vpow2.f32 %v1454_v15 }
 0x348   : > { %v1956_v16 = vpop.eup %1955 }
 0x349   : > { %1841 = vmatmul.mubr.msk.f32.vlgmr.msra.gmra.mxu0 %vm259_vm1, %v1956_v16  ;;  %v501_v20 = vsel %vm259_vm1, %v1956_v16, 0.0 }
 0x34a   : > { %1849 = vmatpush3.msra.mxu0 %v2064_v2  ;;  %1850 = vmatprep.mubr.msk.f32.mxu0 %vm1988_vm0, %v1987_v0 }
 0x34b   : > { %1858 = vmatprep.subr.mxu0 %v1987_v0 }
 0x34c   : > { %v1958_v17 = vpop.eup %1957 }
 0x34d   : > { %1851 = vmatmul.mubr.msk.f32.vlgmr.msra.gmra.mxu0 %vm259_vm1, %v1950_v39  ;;  %v1140_v18 = vsel %vm259_vm1, %v1958_v17, 0.0 }
 0x34e   : > { %1859 = vmatpush3.msra.mxu0 %v2064_v2  ;;  %1141 = vadd.xlane.f32.xlu1 %v1140_v18 }
 0x34f   : > { %1860 = vmatprep.mubr.msk.f32.mxu0 %vm1988_vm0, %v1987_v0  ;;  %1868 = vmatprep.subr.mxu0 %v1987_v0 }
 0x350   : > { %v1960_v21 = vpop.eup %1959 }
 0x351   : > { %1861 = vmatmul.mubr.msk.f32.vlgmr.msra.gmra.mxu0 %vm259_vm1, %v1952_v43  ;;  %v1298_v2 = vsel %vm259_vm1, %v1960_v21, 0.0  ;;  %v1578_v43 = vld [vmem:[%s2245_s2 + $0x18] sm:$0xff] }
 0x352   : > { %1869 = vmatpush3.msra.mxu0 %v983_v19  ;;  %502 = vadd.xlane.f32.xlu1 %v501_v20 }
 0x353   : > { %1870 = vmatprep.mubr.msk.f32.mxu0 %vm1988_vm0, %v1987_v0  ;;  %1878 = vmatprep.subr.mxu0 %v1987_v0 }
 0x354   : > { %v1962_v22 = vpop.eup %1961  ;;  %1912 = vmatpush3.msra.mxu1 %v1578_v43 }
 0x355   : > { %1871 = vmatmul.mubr.msk.f32.vlgmr.msra.gmra.mxu0 %vm259_vm1, %v1954_v3  ;;  %v1456_v23 = vsel %vm259_vm1, %v1962_v22, 0.0  ;;  %1913 = vmatprep.subr.mxu1 %v1987_v0 }
 0x356   : > { %1879 = vmatpush3.msra.mxu0 %v983_v19  ;;  %1299 = vadd.xlane.f32.xlu1 %v1298_v2 }
 0x357   : > { %1880 = vmatprep.mubr.msk.f32.mxu0 %vm1988_vm0, %v1987_v0  ;;  %1888 = vmatprep.subr.mxu0 %v1987_v0 }
 0x358   : > { %1914 = vmatpush3.msra.mxu1 %v1577_v50 }
 0x359   : > { %1881 = vmatmul.mubr.msk.f32.vlgmr.msra.gmra.mxu0 %vm259_vm1, %v1958_v17  ;;  %1915 = vmatprep.subr.mxu1 %v1987_v0 }
 0x35a   : > { %1889 = vmatpush3.msra.mxu0 %v983_v19  ;;  %1457 = vadd.xlane.f32.xlu1 %v1456_v23  ;;  %v1779_v23 = vld [vmem:[%s2246_s3] ss:$0 sm:$0xff] }
 0x35b   : > { %1890 = vmatprep.mubr.msk.f32.mxu0 %vm1988_vm0, %v1987_v0  ;;  %1898 = vmatprep.subr.mxu0 %v1987_v0 }
 0x35c   : > { %1916 = vmatpush3.msra.mxu1 %v1576_v51 }
 0x35d   : > { %1891 = vmatmul.mubr.msk.f32.vlgmr.msra.gmra.mxu0 %vm259_vm1, %v1960_v21  ;;  %1917 = vmatprep.subr.mxu1 %v1987_v0 }
 0x35e   : > { %1899 = vmatpush3.msra.mxu0 %v983_v19  ;;  %341 = vadd.xlane.f32.xlu1 %v340_v24 }
 0x35f   : > { %1900 = vmatprep.mubr.msk.f32.mxu0 %vm1988_vm0, %v1987_v0  ;;  %1918 = vmatpush3.msra.mxu1 %v1575_v56 }
 0x361   : > { %1901 = vmatmul.mubr.msk.f32.vlgmr.msra.gmra.mxu0 %vm259_vm1, %v1962_v22 }
 0x377   : > { %v981_v29 = vpop.xlane.xlu0 %980 }
 0x3d7   : > { %v1142_v27 = vpop.xlane.xlu1 %1141 }
 0x3db   : > { %v503_v28 = vpop.xlane.xlu1 %502 }
 0x3dc   : > { %1963 = vrcp.f32 %v503_v28 }
 0x3dd   : > { %1965 = vrcp.f32 %v661_v25 }
 0x3de   : > { %1967 = vrcp.f32 %v819_v26 }
 0x3df   : > { %1969 = vrcp.f32 %v981_v29  ;;  %v1300_v34 = vpop.xlane.xlu1 %1299 }
 0x3e0   : > { %1971 = vrcp.f32 %v1142_v27 }
 0x3e1   : > { %1973 = vrcp.f32 %v1300_v34 }
 0x3e3   : > { %v1458_v45 = vpop.xlane.xlu1 %1457 }
 0x3e4   : > { %1975 = vrcp.f32 %v1458_v45 }
 0x3e7   : > { %v342_v7 = vpop.xlane.xlu1 %341 }
 0x3e8   : > { %1977 = vrcp.f32 %v342_v7 }
 0x3e9   : > { %v1964_v31 = vpop.eup %1963 }
 0x3ea   : > { %v1966_v38 = vpop.eup %1965 }
 0x3eb   : > { %v1968_v44 = vpop.eup %1967 }
 0x3ec   : > { %v1970_v52 = vpop.eup %1969 }
 0x3ed   : > { %v1972_v57 = vpop.eup %1971 }
 0x3ee   : > { %v1974_v61 = vpop.eup %1973 }
 0x3f1   : > { %v1976_v0 = vpop.eup %1975 }
 0x3f5   : > { %v1978_v11 = vpop.eup %1977 }
 0x3f6   : > { %v420_v13 = vmul.f32 %v1978_v11, %v2146_v49 }
 0x409   : > { %v573_v32 = vpop.f32.mrf.mxu0 }
 0x40a   : > { %v578_v33 = vmul.f32 %v1964_v31, %v573_v32 }
 0x40b   : > { %v1842_v35 = vpop.f32.mrf.mxu0 }
 0x40c   : > { %1535 = vrot.lane.b32.xlu1 %v578_v33, %s2000_s21 }
 0x40d   : > { %v731_v39 = vpop.f32.mrf.mxu0 }
 0x40e   : > { %v736_v40 = vmul.f32 %v1966_v38, %v731_v39 }
 0x40f   : > { %v1852_v41 = vpop.f32.mrf.mxu0 }
 0x410   : > { %1539 = vrot.lane.b32.xlu0 %v736_v40, %s2001_s26 }
 0x411   : > { %v889_v46 = vpop.f32.mrf.mxu0 }
 0x412   : > { %v894_v47 = vmul.f32 %v1968_v44, %v889_v46 }
 0x413   : > { %v1862_v48 = vpop.f32.mrf.mxu0 }
 0x414   : > { %1543 = vrot.lane.b32.xlu1 %v894_v47, %s2002_s7 }
 0x415   : > { %v1054_v53 = vpop.f32.mrf.mxu0 }
 0x416   : > { %v1059_v54 = vmul.f32 %v1970_v52, %v1054_v53 }
 0x417   : > { %v1872_v55 = vpop.f32.mrf.mxu0 }
 0x418   : > { %1547 = vrot.lane.b32.xlu1 %v1059_v54, %s2003_s11 }
 0x419   : > { %v1212_v58 = vpop.f32.mrf.mxu0 }
 0x41a   : > { %v1217_v59 = vmul.f32 %v1972_v57, %v1212_v58 }
 0x41b   : > { %v1882_v60 = vpop.f32.mrf.mxu0 }
 0x41c   : > { %1551 = vrot.lane.b32.xlu1 %v1217_v59, %s1999_s12  ;;  %s249_s12 = scalar_lea.vmem %s2247_s4, %s2048_s20 }
 0x41d   : > { %v1370_v62 = vpop.f32.mrf.mxu0  ;;  %v1657_v2 = vld [vmem:[%s249_s12] sm:$0xff] }
 0x41e   : > { %v1375_v63 = vmul.f32 %v1974_v61, %v1370_v62 }
 0x41f   : > { %v1892_v3 = vpop.f32.mrf.mxu0 }
 0x420   : > { %1555 = vrot.lane.b32.xlu1 %v1375_v63, %s1994_s29 }
 0x421   : > { %v1528_v4 = vpop.f32.mrf.mxu0 }
 0x422   : > { %v1533_v5 = vmul.f32 %v1976_v0, %v1528_v4 }
 0x423   : > { %v1902_v6 = vpop.f32.mrf.mxu0 }
 0x424   : > { %1559 = vrot.lane.b32.xlu1 %v1533_v5, %s1998_s8 }
 0x47e   : > { %v1536_v8 = vpop.permute.xlu1 %1535 }
 0x47f   : > { %v1562_v14 = vsel %vm259_vm1, %v420_v13, %v1536_v8 }
 0x482   : > { %v1540_v1 = vpop.permute.xlu0 %1539 }
 0x483   : > { %v1564_v15 = vsel %vm1563_vm2, %v1562_v14, %v1540_v1 }
 0x486   : > { %v1544_v9 = vpop.permute.xlu1 %1543 }
 0x487   : > { %v1566_v17 = vsel %vm1565_vm3, %v1564_v15, %v1544_v9 }
 0x48a   : > { %v1548_v10 = vpop.permute.xlu1 %1547 }
 0x48b   : > { %v1568_v18 = vsel %vm1567_vm4, %v1566_v17, %v1548_v10 }
 0x48e   : > { %v1552_v12 = vpop.permute.xlu1 %1551 }
 0x48f   : > { %v1570_v19 = vsel %vm1569_vm5, %v1568_v18, %v1552_v12 }
 0x492   : > { %v1556_v16 = vpop.permute.xlu1 %1555 }
 0x493   : > { %v1572_v20 = vsel %vm1571_vm6, %v1570_v19, %v1556_v16 }
 0x496   : > { %v1560_v49 = vpop.permute.xlu1 %1559 }
 0x497   : > { %v1574_v21 = vsel %vm1573_vm7, %v1572_v20, %v1560_v49 }
 0x498   : > { %1920 = vmatmul.mubr.msk.f32.vlgmr.msra.gmra.mxu1 %vm1583_vm8, %v1574_v21 }
 0x558   : > { %v1653_v22 = vpop.f32.mrf.mxu1 }
 0x559   : > { %v1658_v24 = vadd.f32 %v1657_v2, %v1653_v22 }
 0x55a   : > { %v1921_v25 = vpop.f32.mrf.mxu1 }
 0x55b   : > { %v1666_v26 = vadd.f32 %v1779_v23, %v1658_v24 }
 0x55d   : > { %1667 = vst.msk [vmem:[%s253_s17] sm:$0xff] %vm1567_vm4, %v1666_v26 }
 0x55e PF: > { %s15_s18 = sadd.s32 1, %s1985_s18  }
 0x55f   : > { %p12_p4 = scmp.ge.s32.totalorder %s15_s18, 4  }
 0x561   :  { %14 = sbr.rel (!%p12_p4) target bundleno = 1 (0x1), region = 76 }

</bundles_post_ra>
